<compile_context>
chip_gen: v7x
topology: tpu7x:2x2x1
jax: 0.10.0
libtpu: 0.0.40
codegen_flags: <defaults>
</compile_context>

<pallas_src>
import jax
import jax.numpy as jnp
from jax.experimental import pallas as pl
from jax.experimental.pallas import tpu as pltpu

BN_EPS = 1e-5          # nn.BatchNorm1d default
BOTTLENECK = 512       # ClassBlock num_bottleneck
FEAT_DIM = 4032        # NASNet-A-Large feature channels
TK = 1024              # K-reduction tile


# ---------------------------------------------------------------------------
# Fused head kernel: avgpool + Linear1 + BN1d(train) + Dropout + Linear2
# ---------------------------------------------------------------------------
def _head_kernel(feat_ref, w1_ref, g_ref, bt_ref, mask_ref, w2_ref, b2_ref,
                 out_ref, acc_ref):
    k = pl.program_id(0)

    @pl.when(k == 0)
    def _init():
        acc_ref[...] = jnp.zeros_like(acc_ref)

    # Global average pool (over H*W) of this K-chunk in f32, then one bf16
    # MXU matmul chunk accumulated into the f32 scratch.  Linear1's bias is
    # omitted: it is exactly cancelled by the BN mean subtraction below.
    pooled = jnp.mean(feat_ref[...].astype(jnp.float32), axis=1)       # (B, tk)
    acc_ref[...] += jnp.dot(pooled.astype(jnp.bfloat16), w1_ref[...],
                            preferred_element_type=jnp.float32)

    @pl.when(k == pl.num_programs(0) - 1)
    def _finalize():
        h = acc_ref[...]                                               # (B, 512) f32
        # BatchNorm1d in training mode: batch statistics, biased variance.
        mean = jnp.mean(h, axis=0, keepdims=True)
        var = jnp.mean((h - mean) ** 2, axis=0, keepdims=True)
        h = (h - mean) * jax.lax.rsqrt(var + BN_EPS)
        h = h * g_ref[...] + bt_ref[...]
        # Dropout: caller supplies a pre-scaled (mask / keep_prob) f32 mask.
        h = h * mask_ref[...]
        # Classifier linear; output lanes padded to a multiple of 128.
        logits = jnp.dot(h.astype(jnp.bfloat16), w2_ref[...],
                         preferred_element_type=jnp.float32) + b2_ref[...]
        out_ref[...] = logits


def _fused_head(feat_bhwc, w1_mat, gamma, beta, drop_mask, w2_mat, b2_row):
    """feat_bhwc: (B, HW, Kp) bf16, Kp % TK == 0.  Returns (B, N2p) f32 logits."""
    B, HW, Kp = feat_bhwc.shape
    N1 = w1_mat.shape[1]
    N2p = w2_mat.shape[1]
    nk = Kp // TK

    flops = 2 * B * Kp * N1 + 2 * B * N1 * N2p + B * HW * Kp
    bytes_accessed = (feat_bhwc.size * 2 + w1_mat.size * 2 + w2_mat.size * 2
                      + (gamma.size + beta.size + drop_mask.size + b2_row.size) * 4
                      + B * N2p * 4)

    return pl.pallas_call(
        _head_kernel,
        out_shape=jax.ShapeDtypeStruct((B, N2p), jnp.float32),
        grid_spec=pltpu.PrefetchScalarGridSpec(
            num_scalar_prefetch=0,
            grid=(nk,),
            in_specs=[
                pl.BlockSpec((B, HW, TK), lambda k: (0, 0, k)),   # features chunk
                pl.BlockSpec((TK, N1), lambda k: (k, 0)),          # W1 chunk
                pl.BlockSpec((1, N1), lambda k: (0, 0)),           # gamma
                pl.BlockSpec((1, N1), lambda k: (0, 0)),           # beta
                pl.BlockSpec((B, N1), lambda k: (0, 0)),           # dropout mask
                pl.BlockSpec((N1, N2p), lambda k: (0, 0)),         # W2
                pl.BlockSpec((1, N2p), lambda k: (0, 0)),          # b2
            ],
            out_specs=pl.BlockSpec((B, N2p), lambda k: (0, 0)),
            scratch_shapes=[pltpu.VMEM((B, N1), jnp.float32)],
        ),
        compiler_params=pltpu.CompilerParams(
            dimension_semantics=("arbitrary",)),
        cost_estimate=pl.CostEstimate(
            flops=flops, transcendentals=N1, bytes_accessed=bytes_accessed),
    )(feat_bhwc, w1_mat, gamma, beta, drop_mask, w2_mat, b2_row)


# ---------------------------------------------------------------------------
# Forward pass: features (B, 4032, Hf, Wf) -> logits (B, class_num)
# ---------------------------------------------------------------------------
def forward(params, feat_nchw, drop_mask):
    B, C, Hf, Wf = feat_nchw.shape
    HW = Hf * Wf
    Kp = pl.cdiv(C, TK) * TK                  # 4032 -> 4096, lane-aligned
    class_num = params["w2"].shape[0]
    N2p = pl.cdiv(class_num, 128) * 128       # lane-dense classifier output

    # NCHW -> (B, HW, C), zero-pad channels, cast to bf16 MXU operands.
    feat = jnp.transpose(feat_nchw, (0, 2, 3, 1)).reshape(B, HW, C)
    feat = jnp.pad(feat, ((0, 0), (0, 0), (0, Kp - C))).astype(jnp.bfloat16)

    # Linear1 weight (out,in)=(512,4032) -> (Kp, 512), zero-padded K rows.
    w1_mat = jnp.pad(params["w1"].T, ((0, Kp - C), (0, 0))).astype(jnp.bfloat16)
    gamma = params["gamma"].reshape(1, BOTTLENECK).astype(jnp.float32)
    beta = params["beta"].reshape(1, BOTTLENECK).astype(jnp.float32)

    # Classifier weight (class_num,512) -> (512, N2p), zero-padded N columns.
    w2_mat = jnp.pad(params["w2"].T,
                     ((0, 0), (0, N2p - class_num))).astype(jnp.bfloat16)
    b2_row = jnp.pad(params["b2"],
                     (0, N2p - class_num)).reshape(1, N2p).astype(jnp.float32)

    logits_p = _fused_head(feat, w1_mat, gamma, beta,
                           drop_mask.astype(jnp.float32), w2_mat, b2_row)
    return logits_p[:, :class_num]


# ---------------------------------------------------------------------------
# Deterministic synthetic parameters (matching the module's init schemes)
# ---------------------------------------------------------------------------
def init_params(key, class_num):
    k1, k2, k3 = jax.random.split(key, 3)
    # Linear(4032,512): kaiming (fan_out) weight; bias=0 (and cancelled by BN).
    w1 = jax.random.normal(k1, (BOTTLENECK, FEAT_DIM), jnp.float32) * \
        jnp.sqrt(2.0 / BOTTLENECK)
    # BatchNorm1d(512): weight ~ N(1, 0.02), bias = 0.
    gamma = 1.0 + 0.02 * jax.random.normal(k2, (BOTTLENECK,), jnp.float32)
    beta = jnp.zeros((BOTTLENECK,), jnp.float32)
    # Classifier Linear(512, class_num): weight ~ N(0, 0.001), bias = 0.
    w2 = 0.001 * jax.random.normal(k3, (class_num, BOTTLENECK), jnp.float32)
    b2 = jnp.zeros((class_num,), jnp.float32)
    return {"w1": w1, "gamma": gamma, "beta": beta, "w2": w2, "b2": b2}


# ---------------------------------------------------------------------------
if __name__ == "__main__":
    class_num = 100
    batch, Hf, Wf = 2, 4, 4           # small stand-in spatial size
    droprate = 0.5

    key = jax.random.PRNGKey(0)
    k_params, k_feat, k_drop = jax.random.split(key, 3)

    params = init_params(k_params, class_num)

    # Stand-in for self.model.features(x): the NASNet-A-Large backbone output.
    feats = jax.random.normal(k_feat, (batch, FEAT_DIM, Hf, Wf), jnp.float32)

    # Deterministic stand-in for torch Dropout's RNG (train mode), pre-scaled.
    keep = 1.0 - droprate
    drop_mask = jax.random.bernoulli(
        k_drop, keep, (batch, BOTTLENECK)).astype(jnp.float32) / keep

    fwd = jax.jit(forward)
    logits = fwd(params, feats, drop_mask)
    jax.block_until_ready(logits)

    assert logits.shape == (batch, class_num), logits.shape
    assert bool(jnp.all(jnp.isfinite(logits)))
    print("KERNEL_OK")
</pallas_src>

<mosaic_0001>
module attributes {stable_mosaic.version = 11 : i64} {
  func.func @_head_kernel(%arg0: i32, %arg1: memref<2x16x1024xbf16, #tpu.memory_space<vmem>>, %arg2: memref<1024x512xbf16, #tpu.memory_space<vmem>>, %arg3: memref<1x512xf32, #tpu.memory_space<vmem>>, %arg4: memref<1x512xf32, #tpu.memory_space<vmem>>, %arg5: memref<2x512xf32, #tpu.memory_space<vmem>>, %arg6: memref<512x128xbf16, #tpu.memory_space<vmem>>, %arg7: memref<1x128xf32, #tpu.memory_space<vmem>>, %arg8: memref<2x128xf32, #tpu.memory_space<vmem>>, %arg9: memref<2x512xf32, #tpu.memory_space<vmem>>) attributes {dimension_semantics = [#tpu.dimension_semantics<arbitrary>], iteration_bounds = array<i64: 4>, scalar_prefetch = 0 : i64, scratch_operands = 1 : i64, tpu.core_type = #tpu.core_type<tc>, window_params = [{transform_indices = @transform_0, window_bounds = array<i64: 2, 16, 1024>}, {transform_indices = @transform_1, window_bounds = array<i64: 1024, 512>}, {pipeline_mode = #tpu.pipeline_mode<synchronous>, transform_indices = @transform_2, window_bounds = array<i64: 1, 512>}, {pipeline_mode = #tpu.pipeline_mode<synchronous>, transform_indices = @transform_3, window_bounds = array<i64: 1, 512>}, {pipeline_mode = #tpu.pipeline_mode<synchronous>, transform_indices = @transform_4, window_bounds = array<i64: 2, 512>}, {pipeline_mode = #tpu.pipeline_mode<synchronous>, transform_indices = @transform_5, window_bounds = array<i64: 512, 128>}, {pipeline_mode = #tpu.pipeline_mode<synchronous>, transform_indices = @transform_6, window_bounds = array<i64: 1, 128>}, {pipeline_mode = #tpu.pipeline_mode<synchronous>, transform_indices = @transform_7, window_bounds = array<i64: 2, 128>}]} {
    %c0_i32 = arith.constant 0 : i32
    %0 = arith.cmpi eq, %arg0, %c0_i32 : i32
    %1 = arith.extui %0 : i1 to i32
    %c0_i32_0 = arith.constant 0 : i32
    %2 = arith.cmpi ne, %1, %c0_i32_0 : i32
    scf.if %2 {
      %cst_12 = arith.constant 0.000000e+00 : f32
      %17 = vector.broadcast %cst_12 : f32 to vector<2x512xf32>
      %c0_13 = arith.constant 0 : index
      %c0_14 = arith.constant 0 : index
      %18 = vector.load %arg9[%c0_13, %c0_14] : memref<2x512xf32, #tpu.memory_space<vmem>>, vector<2x512xf32>
      tpu.vector_store %arg9[%c0_13, %c0_14], %17 {strides = array<i32>} : memref<2x512xf32, #tpu.memory_space<vmem>>, vector<2x512xf32>,
    } else {
    }
    %c0 = arith.constant 0 : index
    %c0_1 = arith.constant 0 : index
    %c0_2 = arith.constant 0 : index
    %3 = vector.load %arg1[%c0, %c0_1, %c0_2] : memref<2x16x1024xbf16, #tpu.memory_space<vmem>>, vector<2x16x1024xbf16>
    %4 = arith.extf %3 : vector<2x16x1024xbf16> to vector<2x16x1024xf32>
    %cst = arith.constant dense<0.000000e+00> : vector<2x1024xf32>
    %5 = vector.multi_reduction <add>, %4, %cst [1] : vector<2x16x1024xf32> to vector<2x1024xf32>
    %cst_3 = arith.constant 1.600000e+01 : f32
    %6 = vector.broadcast %cst_3 : f32 to vector<2x1024xf32>
    %7 = arith.divf %5, %6 : vector<2x1024xf32>
    %c0_4 = arith.constant 0 : index
    %c0_5 = arith.constant 0 : index
    %8 = vector.load %arg9[%c0_4, %c0_5] : memref<2x512xf32, #tpu.memory_space<vmem>>, vector<2x512xf32>
    %9 = arith.truncf %7 : vector<2x1024xf32> to vector<2x1024xbf16>
    %c0_6 = arith.constant 0 : index
    %c0_7 = arith.constant 0 : index
    %10 = vector.load %arg2[%c0_6, %c0_7] : memref<1024x512xbf16, #tpu.memory_space<vmem>>, vector<1024x512xbf16>
    %cst_8 = arith.constant dense<0.000000e+00> : vector<2x512xf32>
    %11 = tpu.matmul %9, %10, %cst_8 {dimension_numbers = #tpu.dot_dimension_numbers<[1], [0], [0], [1], [0, 0, 1, 1], [], []>} : vector<2x1024xbf16>, vector<1024x512xbf16>, vector<2x512xf32> -> vector<2x512xf32>
    %12 = arith.addf %8, %11 : vector<2x512xf32>
    %c0_9 = arith.constant 0 : index
    %c0_10 = arith.constant 0 : index
    %13 = vector.load %arg9[%c0_9, %c0_10] : memref<2x512xf32, #tpu.memory_space<vmem>>, vector<2x512xf32>
    tpu.vector_store %arg9[%c0_9, %c0_10], %12 {strides = array<i32>} : memref<2x512xf32, #tpu.memory_space<vmem>>, vector<2x512xf32>,
    %c3_i32 = arith.constant 3 : i32
    %14 = arith.cmpi eq, %arg0, %c3_i32 : i32
    %15 = arith.extui %14 : i1 to i32
    %c0_i32_11 = arith.constant 0 : i32
    %16 = arith.cmpi ne, %15, %c0_i32_11 : i32
    scf.if %16 {
      %c0_12 = arith.constant 0 : index
      %c0_13 = arith.constant 0 : index
      %17 = vector.load %arg9[%c0_12, %c0_13] : memref<2x512xf32, #tpu.memory_space<vmem>>, vector<2x512xf32>
      %cst_14 = arith.constant dense<0.000000e+00> : vector<512xf32>
      %18 = vector.multi_reduction <add>, %17, %cst_14 [0] : vector<2x512xf32> to vector<512xf32>
      %19 = vector.shape_cast %18 : vector<512xf32> to vector<1x512xf32>
      %cst_15 = arith.constant 2.000000e+00 : f32
      %20 = vector.broadcast %cst_15 : f32 to vector<1x512xf32>
      %21 = arith.divf %19, %20 : vector<1x512xf32>
      %22 = vector.broadcast %21 : vector<1x512xf32> to vector<2x512xf32>
      %23 = arith.subf %17, %22 : vector<2x512xf32>
      %24 = arith.mulf %23, %23 : vector<2x512xf32>
      %cst_16 = arith.constant dense<0.000000e+00> : vector<512xf32>
      %25 = vector.multi_reduction <add>, %24, %cst_16 [0] : vector<2x512xf32> to vector<512xf32>
      %26 = vector.shape_cast %25 : vector<512xf32> to vector<1x512xf32>
      %cst_17 = arith.constant 2.000000e+00 : f32
      %27 = vector.broadcast %cst_17 : f32 to vector<1x512xf32>
      %28 = arith.divf %26, %27 : vector<1x512xf32>
      %29 = vector.broadcast %21 : vector<1x512xf32> to vector<2x512xf32>
      %30 = arith.subf %17, %29 : vector<2x512xf32>
      %cst_18 = arith.constant 9.99999974E-6 : f32
      %31 = vector.broadcast %cst_18 : f32 to vector<1x512xf32>
      %32 = arith.addf %28, %31 : vector<1x512xf32>
      %33 = math.rsqrt %32 : vector<1x512xf32>
      %34 = vector.broadcast %33 : vector<1x512xf32> to vector<2x512xf32>
      %35 = arith.mulf %30, %34 : vector<2x512xf32>
      %c0_19 = arith.constant 0 : index
      %c0_20 = arith.constant 0 : index
      %36 = vector.load %arg3[%c0_19, %c0_20] : memref<1x512xf32, #tpu.memory_space<vmem>>, vector<1x512xf32>
      %37 = vector.broadcast %36 : vector<1x512xf32> to vector<2x512xf32>
      %38 = arith.mulf %35, %37 : vector<2x512xf32>
      %c0_21 = arith.constant 0 : index
      %c0_22 = arith.constant 0 : index
      %39 = vector.load %arg4[%c0_21, %c0_22] : memref<1x512xf32, #tpu.memory_space<vmem>>, vector<1x512xf32>
      %40 = vector.broadcast %39 : vector<1x512xf32> to vector<2x512xf32>
      %41 = arith.addf %38, %40 : vector<2x512xf32>
      %c0_23 = arith.constant 0 : index
      %c0_24 = arith.constant 0 : index
      %42 = vector.load %arg5[%c0_23, %c0_24] : memref<2x512xf32, #tpu.memory_space<vmem>>, vector<2x512xf32>
      %43 = arith.mulf %41, %42 : vector<2x512xf32>
      %44 = arith.truncf %43 : vector<2x512xf32> to vector<2x512xbf16>
      %c0_25 = arith.constant 0 : index
      %c0_26 = arith.constant 0 : index
      %45 = vector.load %arg6[%c0_25, %c0_26] : memref<512x128xbf16, #tpu.memory_space<vmem>>, vector<512x128xbf16>
      %cst_27 = arith.constant dense<0.000000e+00> : vector<2x128xf32>
      %46 = tpu.matmul %44, %45, %cst_27 {dimension_numbers = #tpu.dot_dimension_numbers<[1], [0], [0], [1], [0, 0, 1, 1], [], []>} : vector<2x512xbf16>, vector<512x128xbf16>, vector<2x128xf32> -> vector<2x128xf32>
      %c0_28 = arith.constant 0 : index
      %c0_29 = arith.constant 0 : index
      %47 = vector.load %arg7[%c0_28, %c0_29] : memref<1x128xf32, #tpu.memory_space<vmem>>, vector<1x128xf32>
      %48 = vector.broadcast %47 : vector<1x128xf32> to vector<2x128xf32>
      %49 = arith.addf %46, %48 : vector<2x128xf32>
      %c0_30 = arith.constant 0 : index
      %c0_31 = arith.constant 0 : index
      %50 = vector.load %arg8[%c0_30, %c0_31] : memref<2x128xf32, #tpu.memory_space<vmem>>, vector<2x128xf32>
      tpu.vector_store %arg8[%c0_30, %c0_31], %49 {strides = array<i32>} : memref<2x128xf32, #tpu.memory_space<vmem>>, vector<2x128xf32>,
    } else {
    }
    return
  }
  func.func @transform_0(%arg0: i32) -> (i32, i32, i32) {
    %c0_i32 = arith.constant 0 : i32
    %c0_i32_0 = arith.constant 0 : i32
    %c0_i32_1 = arith.constant 0 : i32
    return %c0_i32, %c0_i32_0, %arg0 : i32, i32, i32
  }
  func.func @transform_1(%arg0: i32) -> (i32, i32) {
    %c0_i32 = arith.constant 0 : i32
    %c0_i32_0 = arith.constant 0 : i32
    return %arg0, %c0_i32 : i32, i32
  }
  func.func @transform_2(%arg0: i32) -> (i32, i32) {
    %c0_i32 = arith.constant 0 : i32
    %c0_i32_0 = arith.constant 0 : i32
    %c0_i32_1 = arith.constant 0 : i32
    return %c0_i32, %c0_i32_0 : i32, i32
  }
  func.func @transform_3(%arg0: i32) -> (i32, i32) {
    %c0_i32 = arith.constant 0 : i32
    %c0_i32_0 = arith.constant 0 : i32
    %c0_i32_1 = arith.constant 0 : i32
    return %c0_i32, %c0_i32_0 : i32, i32
  }
  func.func @transform_4(%arg0: i32) -> (i32, i32) {
    %c0_i32 = arith.constant 0 : i32
    %c0_i32_0 = arith.constant 0 : i32
    %c0_i32_1 = arith.constant 0 : i32
    return %c0_i32, %c0_i32_0 : i32, i32
  }
  func.func @transform_5(%arg0: i32) -> (i32, i32) {
    %c0_i32 = arith.constant 0 : i32
    %c0_i32_0 = arith.constant 0 : i32
    %c0_i32_1 = arith.constant 0 : i32
    return %c0_i32, %c0_i32_0 : i32, i32
  }
  func.func @transform_6(%arg0: i32) -> (i32, i32) {
    %c0_i32 = arith.constant 0 : i32
    %c0_i32_0 = arith.constant 0 : i32
    %c0_i32_1 = arith.constant 0 : i32
    return %c0_i32, %c0_i32_0 : i32, i32
  }
  func.func @transform_7(%arg0: i32) -> (i32, i32) {
    %c0_i32 = arith.constant 0 : i32
    %c0_i32_0 = arith.constant 0 : i32
    %c0_i32_1 = arith.constant 0 : i32
    return %c0_i32, %c0_i32_0 : i32, i32
  }
}

</mosaic_0001>

<bundles_post_ra>
// kernel: forward.1
= control target key start
LH: loop header
LB: loop body
LE: loop exit
PB: predicated region body
PF: predicated region fallthrough
CT: control target
= control target key end

     0   :  { %12 = vsyncpa [#allocation5], 0  ;;  %s4097_s24 = smov 0   ;;  %s4099_s25 = smov 0   ;;  %s4655_s0 = inlined_call_operand.vmem [shape: bf16[2,16,4096], index: 0, kind: input, shape index: {}]   ;;  %s4656_s1 = inlined_call_operand.vmem [shape: bf16[4096,512], index: 1, kind: input, shape index: {}]   ;;  %s4657_s2 = inlined_call_operand.vmem [shape: f32[1,512], index: 2, kind: input, shape index: {}]   ;;  %s4658_s3 = inlined_call_operand.vmem [shape: f32[1,512], index: 3, kind: input, shape index: {}]   ;;  %s4659_s4 = inlined_call_operand.vmem [shape: f32[2,512], index: 4, kind: input, shape index: {}]   ;;  %s4660_s5 = inlined_call_operand.vmem [shape: bf16[512,128], index: 5, kind: input, shape index: {}]   ;;  %s4661_s6 = inlined_call_operand.vmem [shape: f32[1,128], index: 6, kind: input, shape index: {}]   ;;  %s4662_s7 = inlined_call_operand.hbm [shape: f32[2,128], index: 7, kind: output, shape index: {}]  }
   0x1   :  { %s4101_s26 = smov 0  }
   0x2 LB: > { %s4113_s27 = sadd.s32 4294967295, %s4052_s26   ;;  %s4116_s28 = sadd.s32 1, %s4052_s26   ;;  %s4052_s26 = sphi %s4101_s26, %s4665_s26   ;;  %s4048_s25 = sphi %s4099_s25, %s4664_s25   ;;  %s4044_s24 = sphi %s4097_s24, %s4663_s24  }
   0x3   : > { %s22_s29 = ssub.s32 %s4052_s26, %s4116_s28  ;;  %s25_s30 = sadd.s32 1, %s4048_s25 }
   0x4   : > { %p23_p0 = scmp.eq.s32.totalorder %s22_s29, 0  ;;  %p32_p1 = scmp.ne.s32.totalorder %s4048_s25, %s4044_s24 }
   0x5   : > { %p33_p2 = scmp.eq.s32.totalorder %s4052_s26, 0  ;;  %p3168_p4 = scmp.ge.s32.totalorder %s4052_s26, 4 }
   0x6   : > { %s4125_s8 = scalar_select %p23_p0, %s4048_s25, %s25_s30  }
   0x7   : > { %p34_p3 = por %p33_p2, %p32_p1  ;;  %225 = sbr.rel (%p3168_p4) target bundleno = 26 (0x1a), region = 36 }
   0xe   : > { %228 = sbr.rel (!%p34_p3) target bundleno = 26 (0x1a), region = 40  ;;  %s230_s9 = sand.u32 (%p34_p3), 1, %s4048_s25  }
   0xf   : > { %s3472_s10 = sshll.u32 (%p34_p3), %s4052_s26, 5  ;;  %s3169_s11 = sshll.u32 (%p34_p3), %s230_s9, 7 }
  0x10   : > { %s4133_s14 = scalar_lea.vmem (%p34_p3), %s4655_s0, %s3472_s10  ;;  %s232_s15 = scalar_lea.vmem (%p34_p3), [#allocation3], %s3169_s11 }
  0x11   : > { %v248_v0 = vld [vmem:[%s4133_s14] sm:$0xff] (%p34_p3)  ;;  %v250_v1 = vld [vmem:[%s4133_s14 + $0x8] sm:$0xff] (%p34_p3)  ;;  %v252_v2 = vld [vmem:[%s4133_s14 + $0x10] sm:$0xff] (%p34_p3) }
  0x12   : > { %249 = vst [vmem:[%s232_s15] sm:$0xff] (%p34_p3), %v248_v0  ;;  %251 = vst [vmem:[%s232_s15 + $0x8] sm:$0xff] (%p34_p3), %v250_v1  ;;  %v254_v3 = vld [vmem:[%s4133_s14 + $0x18] sm:$0xff] (%p34_p3)  ;;  %v256_v4 = vld [vmem:[%s4133_s14 + $0x80] sm:$0xff] (%p34_p3) }
  0x13   : > { %253 = vst [vmem:[%s232_s15 + $0x10] sm:$0xff] (%p34_p3), %v252_v2  ;;  %v258_v5 = vld [vmem:[%s4133_s14 + $0x88] sm:$0xff] (%p34_p3)  ;;  %255 = vst [vmem:[%s232_s15 + $0x18] sm:$0xff] (%p34_p3), %v254_v3  ;;  %v260_v6 = vld [vmem:[%s4133_s14 + $0x90] sm:$0xff] (%p34_p3) }
  0x14   : > { %257 = vst [vmem:[%s232_s15 + $0x20] sm:$0xff] (%p34_p3), %v256_v4  ;;  %259 = vst [vmem:[%s232_s15 + $0x28] sm:$0xff] (%p34_p3), %v258_v5  ;;  %v262_v7 = vld [vmem:[%s4133_s14 + $0x98] sm:$0xff] (%p34_p3)  ;;  %v264_v8 = vld [vmem:[%s4133_s14 + $0x100] sm:$0xff] (%p34_p3) }
  0x15   : > { %261 = vst [vmem:[%s232_s15 + $0x30] sm:$0xff] %v260_v6  ;;  %263 = vst [vmem:[%s232_s15 + $0x38] sm:$0xff] %v262_v7  ;;  %v266_v9 = vld [vmem:[%s4133_s14 + $0x108] sm:$0xff]  ;;  %v268_v10 = vld [vmem:[%s4133_s14 + $0x110] sm:$0xff] }
  0x16   : > { %265 = vst [vmem:[%s232_s15 + $0x40] sm:$0xff] %v264_v8  ;;  %v270_v11 = vld [vmem:[%s4133_s14 + $0x118] sm:$0xff]  ;;  %267 = vst [vmem:[%s232_s15 + $0x48] sm:$0xff] %v266_v9  ;;  %v272_v12 = vld [vmem:[%s4133_s14 + $0x180] sm:$0xff] }
  0x17   : > { %269 = vst [vmem:[%s232_s15 + $0x50] sm:$0xff] %v268_v10  ;;  %271 = vst [vmem:[%s232_s15 + $0x58] sm:$0xff] %v270_v11  ;;  %v274_v13 = vld [vmem:[%s4133_s14 + $0x188] sm:$0xff]  ;;  %v276_v14 = vld [vmem:[%s4133_s14 + $0x190] sm:$0xff] }
  0x18   : > { %273 = vst [vmem:[%s232_s15 + $0x60] sm:$0xff] %v272_v12  ;;  %275 = vst [vmem:[%s232_s15 + $0x68] sm:$0xff] %v274_v13  ;;  %v278_v15 = vld [vmem:[%s4133_s14 + $0x198] sm:$0xff] }
  0x19   : > { %277 = vst [vmem:[%s232_s15 + $0x70] sm:$0xff] %v276_v14  ;;  %279 = vst [vmem:[%s232_s15 + $0x78] sm:$0xff] %v278_v15 }
  0x1a PF: > { %p3172_p5 = scmp.ge.s32.totalorder %s4052_s26, 1  ;;  %p294_p6 = scmp.lt.s32.totalorder %s4052_s26, 5 }
  0x1c   : > { %p295_p7 = pnand %p3172_p5, %p294_p6 }
  0x1d   : > { %s301_s16 = sand.u32 (!%p295_p7), 1, %s4044_s24   ;;  %s3174_s17 = sshll.u32 (!%p295_p7), %s4113_s27, 7 }
  0x1e   : > { %298 = sbr.rel (%p295_p7) target bundleno = 861 (0x35d), region = 67  ;;  %s3173_s18 = sshll.u32 (!%p295_p7), %s301_s16, 7 }
  0x1f   : > { %p335_p8 = scmp.lt.s32.totalorder (!%p295_p7), %s3174_s17, 511  ;;  %s4160_s23 = scalar_lea.vmem (!%p295_p7), [#allocation3], %s3173_s18 }
  0x20   : > { %p3177_p9 = scmp.ne.s32.totalorder (!%p295_p7), %s4113_s27, 0 }
  0x25   : > { %s4667_s17 = smov (!%p335_p8, %s3174_s17), 511  ;;  %345 = sbr.rel (%p3177_p9) target bundleno = 44 (0x2c), region = 75 }
  0x26   : > { %s3473_s19 = sshll.u32 %s4667_s17, 4  ;;  %v4054_v16 = vmov (!%p3177_p9), 0.0  }
  0x27   : > { %s4158_s22 = scalar_lea.vmem %s4656_s1, %s3473_s19  ;;  %346 = vst [vmem:[#allocation2] sm:$0xff] (!%p3177_p9), %v4054_v16 }
  0x2c PF: > { %v3575_v17 = vld [vmem:[%s4158_s22 + $0x4] ss:$16 sps:$4 sm:$0xff]   ;;  %v3577_v18 = vld [vmem:[%s4158_s22 + $0xc] ss:$16 sps:$4 sm:$0xff]   ;;  %v3579_v19 = vld [vmem:[%s4158_s22] ss:$16 sps:$4 sm:$0xff]  }
  0x2d   : > { %2134 = vmatprep.subr.bf16.mxu0 %v3575_v17  ;;  %v3580_v20 = vld [vmem:[%s4158_s22 + $0x8] ss:$16 sps:$4 sm:$0xff]   ;;  %2298 = vmatprep.subr.bf16.mxu1 %v3577_v18  ;;  %v3581_v21 = vld [vmem:[%s4158_s22 + $0x24] ss:$16 sps:$4 sm:$0xff]   ;;  %v3583_v22 = vld [vmem:[%s4158_s22 + $0x2c] ss:$16 sps:$4 sm:$0xff]  }
  0x2e   : > { %2135 = vmatpush1.bf16.msra.mxu0 %v3579_v19  ;;  %2299 = vmatpush1.bf16.msra.mxu1 %v3580_v20  ;;  %v3585_v23 = vld [vmem:[%s4158_s22 + $0x20] ss:$16 sps:$4 sm:$0xff]   ;;  %v3586_v24 = vld [vmem:[%s4158_s22 + $0x28] ss:$16 sps:$4 sm:$0xff]   ;;  %v3587_v25 = vld [vmem:[%s4158_s22 + $0x44] ss:$16 sps:$4 sm:$0xff]  }
  0x2f   : > { %2136 = vmatprep.subr.bf16.mxu0 %v3581_v21  ;;  %2300 = vmatprep.subr.bf16.mxu1 %v3583_v22  ;;  %v3589_v26 = vld [vmem:[%s4158_s22 + $0x4c] ss:$16 sps:$4 sm:$0xff]   ;;  %v3591_v27 = vld [vmem:[%s4158_s22 + $0x40] ss:$16 sps:$4 sm:$0xff]   ;;  %v3592_v28 = vld [vmem:[%s4158_s22 + $0x48] ss:$16 sps:$4 sm:$0xff]  }
  0x30   : > { %v3593_v29 = vld [vmem:[%s4158_s22 + $0x64] ss:$16 sps:$4 sm:$0xff]   ;;  %v3595_v30 = vld [vmem:[%s4158_s22 + $0x6c] ss:$16 sps:$4 sm:$0xff]   ;;  %v3597_v31 = vld [vmem:[%s4158_s22 + $0x60] ss:$16 sps:$4 sm:$0xff]  }
  0x31   : > { %v3598_v32 = vld [vmem:[%s4158_s22 + $0x68] ss:$16 sps:$4 sm:$0xff]   ;;  %v3599_v33 = vld [vmem:[%s4158_s22 + $0x84] ss:$16 sps:$4 sm:$0xff]   ;;  %v3601_v34 = vld [vmem:[%s4158_s22 + $0x8c] ss:$16 sps:$4 sm:$0xff]  }
  0x32   : > { %2137 = vmatpush1.bf16.msra.mxu0 %v3585_v23  ;;  %2301 = vmatpush1.bf16.msra.mxu1 %v3586_v24  ;;  %v3603_v35 = vld [vmem:[%s4158_s22 + $0x80] ss:$16 sps:$4 sm:$0xff]   ;;  %v3604_v36 = vld [vmem:[%s4158_s22 + $0x88] ss:$16 sps:$4 sm:$0xff]   ;;  %v3605_v37 = vld [vmem:[%s4158_s22 + $0xa4] ss:$16 sps:$4 sm:$0xff]  }
  0x33   : > { %2138 = vmatprep.subr.bf16.mxu0 %v3587_v25  ;;  %2302 = vmatprep.subr.bf16.mxu1 %v3589_v26  ;;  %v3607_v38 = vld [vmem:[%s4158_s22 + $0xac] ss:$16 sps:$4 sm:$0xff]   ;;  %v3609_v39 = vld [vmem:[%s4158_s22 + $0xa0] ss:$16 sps:$4 sm:$0xff]   ;;  %v3610_v40 = vld [vmem:[%s4158_s22 + $0xa8] ss:$16 sps:$4 sm:$0xff]  }
  0x34   : > { %v3611_v41 = vld [vmem:[%s4158_s22 + $0xc4] ss:$16 sps:$4 sm:$0xff]   ;;  %v3613_v42 = vld [vmem:[%s4158_s22 + $0xcc] ss:$16 sps:$4 sm:$0xff]   ;;  %v3615_v43 = vld [vmem:[%s4158_s22 + $0xc0] ss:$16 sps:$4 sm:$0xff]  }
  0x35   : > { %v3616_v44 = vld [vmem:[%s4158_s22 + $0xc8] ss:$16 sps:$4 sm:$0xff]   ;;  %v3617_v45 = vld [vmem:[%s4158_s22 + $0xe4] ss:$16 sps:$4 sm:$0xff]   ;;  %v3619_v46 = vld [vmem:[%s4158_s22 + $0xec] ss:$16 sps:$4 sm:$0xff]  }
  0x36   : > { %2139 = vmatpush1.bf16.msra.mxu0 %v3591_v27  ;;  %2303 = vmatpush1.bf16.msra.mxu1 %v3592_v28  ;;  %v3621_v47 = vld [vmem:[%s4158_s22 + $0xe0] ss:$16 sps:$4 sm:$0xff]   ;;  %v3622_v48 = vld [vmem:[%s4158_s22 + $0xe8] ss:$16 sps:$4 sm:$0xff]   ;;  %v3623_v49 = vld [vmem:[%s4158_s22 + $0x104] ss:$16 sps:$4 sm:$0xff]  }
  0x37   : > { %2140 = vmatprep.subr.bf16.mxu0 %v3593_v29  ;;  %2304 = vmatprep.subr.bf16.mxu1 %v3595_v30  ;;  %v3625_v50 = vld [vmem:[%s4158_s22 + $0x10c] ss:$16 sps:$4 sm:$0xff]   ;;  %v3627_v51 = vld [vmem:[%s4158_s22 + $0x100] ss:$16 sps:$4 sm:$0xff]   ;;  %v3628_v52 = vld [vmem:[%s4158_s22 + $0x108] ss:$16 sps:$4 sm:$0xff]  }
  0x38   : > { %v3629_v53 = vld [vmem:[%s4158_s22 + $0x124] ss:$16 sps:$4 sm:$0xff]   ;;  %v3631_v54 = vld [vmem:[%s4158_s22 + $0x12c] ss:$16 sps:$4 sm:$0xff]   ;;  %v3633_v55 = vld [vmem:[%s4158_s22 + $0x120] ss:$16 sps:$4 sm:$0xff]  }
  0x39   : > { %v3634_v56 = vld [vmem:[%s4158_s22 + $0x128] ss:$16 sps:$4 sm:$0xff]   ;;  %v3635_v57 = vld [vmem:[%s4158_s22 + $0x144] ss:$16 sps:$4 sm:$0xff]   ;;  %v3637_v58 = vld [vmem:[%s4158_s22 + $0x14c] ss:$16 sps:$4 sm:$0xff]  }
  0x3a   : > { %2141 = vmatpush1.bf16.msra.mxu0 %v3597_v31  ;;  %2305 = vmatpush1.bf16.msra.mxu1 %v3598_v32  ;;  %v3639_v59 = vld [vmem:[%s4158_s22 + $0x140] ss:$16 sps:$4 sm:$0xff]   ;;  %v3640_v60 = vld [vmem:[%s4158_s22 + $0x148] ss:$16 sps:$4 sm:$0xff]   ;;  %v3641_v61 = vld [vmem:[%s4158_s22 + $0x164] ss:$16 sps:$4 sm:$0xff]  }
  0x3b   : > { %2142 = vmatprep.subr.bf16.mxu0 %v3599_v33  ;;  %2306 = vmatprep.subr.bf16.mxu1 %v3601_v34  ;;  %v3643_v62 = vld [vmem:[%s4158_s22 + $0x16c] ss:$16 sps:$4 sm:$0xff]   ;;  %v3645_v63 = vld [vmem:[%s4158_s22 + $0x160] ss:$16 sps:$4 sm:$0xff]   ;;  %v3646_v0 = vld [vmem:[%s4158_s22 + $0x168] ss:$16 sps:$4 sm:$0xff]  }
  0x3c   : > { %v347_v1 = vld [vmem:[%s4160_s23] sm:$0xff]  ;;  %v3647_v7 = vld [vmem:[%s4158_s22 + $0x184] ss:$16 sps:$4 sm:$0xff]   ;;  %v3651_v17 = vld [vmem:[%s4158_s22 + $0x180] ss:$16 sps:$4 sm:$0xff]   ;;  %vm829_vm0 = vcmask 1041409  }
  0x3d   : > { %v351_v2 = vld [vmem:[%s4160_s23 + $0x20] sm:$0xff]  ;;  %v363_v5 = vunpack.c.l.bf16 %v347_v1  ;;  %v364_v6 = vunpack.c.h.bf16 %v347_v1  ;;  %v3653_v21 = vld [vmem:[%s4158_s22 + $0x1a4] ss:$16 sps:$4 sm:$0xff]   ;;  %v3657_v29 = vld [vmem:[%s4158_s22 + $0x1a0] ss:$16 sps:$4 sm:$0xff]   ;;  %p3434_p10 = scmp.ne.s32.totalorder %s4113_s27, 3 }
  0x3e   : > { %2143 = vmatpush1.bf16.msra.mxu0 %v3603_v35  ;;  %2307 = vmatpush1.bf16.msra.mxu1 %v3604_v36  ;;  %v355_v3 = vld [vmem:[%s4160_s23 + $0x40] sm:$0xff]  ;;  %v371_v8 = vunpack.c.l.bf16 %v351_v2  ;;  %v372_v9 = vunpack.c.h.bf16 %v351_v2  ;;  %v3659_v33 = vld [vmem:[%s4158_s22 + $0x1c4] ss:$16 sps:$4 sm:$0xff]   ;;  %vm2513_vm1 = vcmask (!%p3434_p10), 1041408  }
  0x3f   : > { %2144 = vmatprep.subr.bf16.mxu0 %v3605_v37  ;;  %2308 = vmatprep.subr.bf16.mxu1 %v3607_v38  ;;  %v359_v4 = vld [vmem:[%s4160_s23 + $0x60] sm:$0xff]  ;;  %v379_v10 = vunpack.c.l.bf16 %v355_v3  ;;  %v380_v11 = vunpack.c.h.bf16 %v355_v3 }
  0x40   : > { %v3649_v12 = vld [vmem:[%s4158_s22 + $0x18c] ss:$16 sps:$4 sm:$0xff]   ;;  %v387_v13 = vunpack.c.l.bf16 %v359_v4  ;;  %v388_v14 = vunpack.c.h.bf16 %v359_v4  ;;  %v402_v15 = vadd.f32 %v372_v9, %v364_v6  ;;  %v395_v16 = vadd.f32 %v371_v8, %v363_v5  ;;  %v3652_v18 = vld [vmem:[%s4158_s22 + $0x188] ss:$16 sps:$4 sm:$0xff]   ;;  %v3671_v8 = vld [vmem:[%s4158_s22 + $0x200] ss:$16 sps:$4 sm:$0xff]  }
  0x41   : > { %v3655_v24 = vld [vmem:[%s4158_s22 + $0x1ac] ss:$16 sps:$4 sm:$0xff]   ;;  %v3658_v30 = vld [vmem:[%s4158_s22 + $0x1a8] ss:$16 sps:$4 sm:$0xff]  }
  0x42   : > { %2145 = vmatpush1.bf16.msra.mxu0 %v3609_v39  ;;  %2309 = vmatpush1.bf16.msra.mxu1 %v3610_v40  ;;  %v458_v19 = vadd.f32 %v388_v14, %v380_v11  ;;  %v451_v20 = vadd.f32 %v387_v13, %v379_v10  ;;  %v403_v22 = vrot.slane %v402_v15, 4  ;;  %v396_v23 = vrot.slane %v395_v16, 4  ;;  %v3661_v36 = vld [vmem:[%s4158_s22 + $0x1cc] ss:$16 sps:$4 sm:$0xff]   ;;  %v3674_v9 = vld [vmem:[%s4158_s22 + $0x208] ss:$16 sps:$4 sm:$0xff]  }
  0x43   : > { %2146 = vmatprep.subr.bf16.mxu0 %v3611_v41  ;;  %2310 = vmatprep.subr.bf16.mxu1 %v3613_v42  ;;  %v3663_v41 = vld [vmem:[%s4158_s22 + $0x1c0] ss:$16 sps:$4 sm:$0xff]   ;;  %v3664_v42 = vld [vmem:[%s4158_s22 + $0x1c8] ss:$16 sps:$4 sm:$0xff]   ;;  %v3679_v13 = vld [vmem:[%s4158_s22 + $0x224] ss:$16 sps:$4 sm:$0xff]  }
  0x44   : > { %v459_v25 = vrot.slane %v458_v19, 4  ;;  %v452_v26 = vrot.slane %v451_v20, 4  ;;  %v404_v27 = vadd.f32 %v403_v22, %v402_v15  ;;  %v397_v28 = vadd.f32 %v396_v23, %v395_v16  ;;  %v3682_v14 = vld [vmem:[%s4158_s22 + $0x22c] ss:$16 sps:$4 sm:$0xff]   ;;  %v3677_v15 = vld [vmem:[%s4158_s22 + $0x220] ss:$16 sps:$4 sm:$0xff]  }
  0x45   : > { %v3680_v16 = vld [vmem:[%s4158_s22 + $0x228] ss:$16 sps:$4 sm:$0xff]   ;;  %v3694_v22 = vld [vmem:[%s4158_s22 + $0x26c] ss:$16 sps:$4 sm:$0xff]   ;;  %v3689_v23 = vld [vmem:[%s4158_s22 + $0x260] ss:$16 sps:$4 sm:$0xff]  }
  0x46   : > { %2147 = vmatpush1.bf16.msra.mxu0 %v3615_v43  ;;  %2311 = vmatpush1.bf16.msra.mxu1 %v3616_v44  ;;  %v460_v31 = vadd.f32 %v459_v25, %v458_v19  ;;  %v453_v32 = vadd.f32 %v452_v26, %v451_v20  ;;  %v405_v34 = vrot.slane %v404_v27, 2  ;;  %v398_v35 = vrot.slane %v397_v28, 2  ;;  %v3683_v19 = vld [vmem:[%s4158_s22 + $0x240] ss:$16 sps:$4 sm:$0xff]   ;;  %v3686_v20 = vld [vmem:[%s4158_s22 + $0x248] ss:$16 sps:$4 sm:$0xff]  }
  0x47   : > { %2148 = vmatprep.subr.bf16.mxu0 %v3617_v45  ;;  %2312 = vmatprep.subr.bf16.mxu1 %v3619_v46  ;;  %v3665_v45 = vld [vmem:[%s4158_s22 + $0x1e4] ss:$16 sps:$4 sm:$0xff]   ;;  %v3700_v26 = vld [vmem:[%s4158_s22 + $0x28c] ss:$16 sps:$4 sm:$0xff]  }
  0x48   : > { %v461_v37 = vrot.slane %v460_v31, 2  ;;  %v454_v38 = vrot.slane %v453_v32, 2  ;;  %v406_v39 = vadd.f32 %v405_v34, %v404_v27  ;;  %v399_v40 = vadd.f32 %v398_v35, %v397_v28  ;;  %v3697_v25 = vld [vmem:[%s4158_s22 + $0x284] ss:$16 sps:$4 sm:$0xff]   ;;  %v3695_v27 = vld [vmem:[%s4158_s22 + $0x280] ss:$16 sps:$4 sm:$0xff]  }
  0x49   : > { %v3698_v28 = vld [vmem:[%s4158_s22 + $0x288] ss:$16 sps:$4 sm:$0xff]   ;;  %v352_v34 = vld [vmem:[%s4160_s23 + $0x28] sm:$0xff] }
  0x4a   : > { %2149 = vmatpush1.bf16.msra.mxu0 %v3621_v47  ;;  %2313 = vmatpush1.bf16.msra.mxu1 %v3622_v48  ;;  %v462_v43 = vadd.f32 %v461_v37, %v460_v31  ;;  %v455_v44 = vadd.f32 %v454_v38, %v453_v32  ;;  %v407_v46 = vrot.slane %v406_v39, 1  ;;  %v400_v47 = vrot.slane %v399_v40, 1  ;;  %v3667_v48 = vld [vmem:[%s4158_s22 + $0x1ec] ss:$16 sps:$4 sm:$0xff]   ;;  %v3701_v31 = vld [vmem:[%s4158_s22 + $0x2a0] ss:$16 sps:$4 sm:$0xff]  }
  0x4b   : > { %2150 = vmatprep.subr.bf16.mxu0 %v3623_v49  ;;  %2314 = vmatprep.subr.bf16.mxu1 %v3625_v50  ;;  %v3704_v32 = vld [vmem:[%s4158_s22 + $0x2a8] ss:$16 sps:$4 sm:$0xff]   ;;  %v356_v35 = vld [vmem:[%s4160_s23 + $0x48] sm:$0xff] }
  0x4c   : > { %v463_v49 = vrot.slane %v462_v43, 1  ;;  %v456_v50 = vrot.slane %v455_v44, 1 }
  0x4e   : > { %2151 = vmatpush1.bf16.msra.mxu0 %v3627_v51  ;;  %2315 = vmatpush1.bf16.msra.mxu1 %v3628_v52  ;;  %v408_v51 = vadd.f32 %v407_v46, %v406_v39  ;;  %v401_v52 = vadd.f32 %v400_v47, %v399_v40  ;;  %v3709_v39 = vld [vmem:[%s4158_s22 + $0x2c4] ss:$16 sps:$4 sm:$0xff]   ;;  %v373_v40 = vunpack.c.l.bf16 %v352_v34 }
  0x4f   : > { %2152 = vmatprep.subr.bf16.mxu0 %v3629_v53  ;;  %2316 = vmatprep.subr.bf16.mxu1 %v3631_v54  ;;  %v3669_v53 = vld [vmem:[%s4158_s22 + $0x1e0] ss:$16 sps:$4 sm:$0xff]   ;;  %v3670_v54 = vld [vmem:[%s4158_s22 + $0x1e8] ss:$16 sps:$4 sm:$0xff]  }
  0x52   : > { %2153 = vmatpush1.bf16.msra.mxu0 %v3633_v55  ;;  %2317 = vmatpush1.bf16.msra.mxu1 %v3634_v56  ;;  %v464_v55 = vadd.f32 %v463_v49, %v462_v43  ;;  %v457_v56 = vadd.f32 %v456_v50, %v455_v44  ;;  %v382_v43 = vunpack.c.h.bf16 %v356_v35  ;;  %v3712_v44 = vld [vmem:[%s4158_s22 + $0x2cc] ss:$16 sps:$4 sm:$0xff]   ;;  %v3707_v49 = vld [vmem:[%s4158_s22 + $0x2c0] ss:$16 sps:$4 sm:$0xff]   ;;  %v3710_v50 = vld [vmem:[%s4158_s22 + $0x2c8] ss:$16 sps:$4 sm:$0xff]  }
  0x53   : > { %2154 = vmatprep.subr.bf16.mxu0 %v3635_v57  ;;  %2318 = vmatprep.subr.bf16.mxu1 %v3637_v58  ;;  %v509_v57 = vmul.f32 0.0625, %v408_v51  ;;  %v3673_v58 = vld [vmem:[%s4158_s22 + $0x204] ss:$16 sps:$4 sm:$0xff]  }
  0x56   : > { %2155 = vmatpush1.bf16.msra.mxu0 %v3639_v59  ;;  %2319 = vmatpush1.bf16.msra.mxu1 %v3640_v60  ;;  %v508_v59 = vmul.f32 0.0625, %v401_v52  ;;  %v517_v60 = vmul.f32 0.0625, %v464_v55 }
  0x57   : > { %2156 = vmatprep.subr.bf16.mxu0 %v3641_v61  ;;  %2320 = vmatprep.subr.bf16.mxu1 %v3643_v62  ;;  %v3676_v61 = vld [vmem:[%s4158_s22 + $0x20c] ss:$16 sps:$4 sm:$0xff]   ;;  %v516_v62 = vmul.f32 0.0625, %v457_v56 }
  0x58   : > { %v534_v1 = vpack.c.bf16 %v517_v60, %v517_v60  ;;  %v3718_v56 = vld [vmem:[%s4158_s22 + $0x2ec] ss:$16 sps:$4 sm:$0xff]   ;;  %v3713_v60 = vld [vmem:[%s4158_s22 + $0x2e0] ss:$16 sps:$4 sm:$0xff]  }
  0x59   : > { %v533_v2 = vpack.c.bf16 %v516_v62, %v516_v62 }
  0x5a   : > { %2157 = vmatpush1.bf16.msra.mxu0 %v3645_v63  ;;  %2321 = vmatpush1.bf16.msra.mxu1 %v3646_v0  ;;  %v526_v63 = vpack.c.bf16 %v509_v57, %v509_v57  ;;  %v525_v0 = vpack.c.bf16 %v508_v59, %v508_v59  ;;  %v822_v5 = vunpack.c.l.b16 %v534_v1 }
  0x5b   : > { %2158 = vmatprep.subr.bf16.mxu0 %v3647_v7  ;;  %2322 = vmatprep.subr.bf16.mxu1 %v3649_v12  ;;  %v821_v6 = vunpack.c.l.b16 %v533_v2 }
  0x5c   : > { %v814_v3 = vunpack.c.l.b16 %v526_v63  ;;  %v813_v4 = vunpack.c.l.b16 %v525_v0  ;;  %v3721_v63 = vld [vmem:[%s4158_s22 + $0x304] ss:$16 sps:$4 sm:$0xff]  }
  0x5e   : > { %2159 = vmatpush1.bf16.msra.mxu0 %v3651_v17  ;;  %2323 = vmatpush1.bf16.msra.mxu1 %v3652_v18  ;;  %v831_v7 = vsel %vm829_vm0, %v822_v5, %v814_v3  ;;  %v830_v10 = vsel %vm829_vm0, %v821_v6, %v813_v4  ;;  %v3685_v17 = vld [vmem:[%s4158_s22 + $0x244] ss:$16 sps:$4 sm:$0xff]   ;;  %v3688_v18 = vld [vmem:[%s4158_s22 + $0x24c] ss:$16 sps:$4 sm:$0xff]   ;;  %v3719_v5 = vld [vmem:[%s4158_s22 + $0x300] ss:$16 sps:$4 sm:$0xff]  }
  0x5f   : > { %2160 = vmatprep.subr.bf16.mxu0 %v3653_v21  ;;  %2324 = vmatprep.subr.bf16.mxu1 %v3655_v24  ;;  %v839_v11 = vpack.c.b16 %v831_v7, %v831_v7  ;;  %v838_v12 = vpack.c.b16 %v830_v10, %v830_v10  ;;  %v3691_v21 = vld [vmem:[%s4158_s22 + $0x264] ss:$16 sps:$4 sm:$0xff]   ;;  %v3692_v24 = vld [vmem:[%s4158_s22 + $0x268] ss:$16 sps:$4 sm:$0xff]   ;;  %v3724_v3 = vld [vmem:[%s4158_s22 + $0x30c] ss:$16 sps:$4 sm:$0xff]  }
  0x60   : > { %v3722_v7 = vld [vmem:[%s4158_s22 + $0x308] ss:$16 sps:$4 sm:$0xff]  }
  0x61   : > { %2166 = vmatprep.mubr.bf16.mxu0 %v839_v11  ;;  %2330 = vmatprep.mubr.bf16.mxu1 %v839_v11 }
  0x62   : > { %2161 = vmatpush1.bf16.msra.mxu0 %v3657_v29  ;;  %2325 = vmatpush1.bf16.msra.mxu1 %v3658_v30  ;;  %v3703_v29 = vld [vmem:[%s4158_s22 + $0x2a4] ss:$16 sps:$4 sm:$0xff]   ;;  %v3706_v30 = vld [vmem:[%s4158_s22 + $0x2ac] ss:$16 sps:$4 sm:$0xff]  }
  0x63   : > { %2162 = vmatprep.subr.bf16.mxu0 %v3659_v33  ;;  %2326 = vmatprep.subr.bf16.mxu1 %v3661_v36  ;;  %v348_v33 = vld [vmem:[%s4160_s23 + $0x8] sm:$0xff] }
  0x64   : > { %v360_v36 = vld [vmem:[%s4160_s23 + $0x68] sm:$0xff]  ;;  %v365_v37 = vunpack.c.l.bf16 %v348_v33  ;;  %v366_v38 = vunpack.c.h.bf16 %v348_v33  ;;  %v3742_v33 = vld [vmem:[%s4158_s22 + $0x36c] ss:$16 sps:$4 sm:$0xff]  }
  0x65   : > { %v390_v46 = vunpack.c.h.bf16 %v360_v36 }
  0x66   : > { %2163 = vmatpush1.bf16.msra.mxu0 %v3663_v41  ;;  %2327 = vmatpush1.bf16.msra.mxu1 %v3664_v42  ;;  %v374_v41 = vunpack.c.h.bf16 %v352_v34  ;;  %v381_v42 = vunpack.c.l.bf16 %v356_v35  ;;  %v3737_v35 = vld [vmem:[%s4158_s22 + $0x360] ss:$16 sps:$4 sm:$0xff]  }
  0x67   : > { %2164 = vmatprep.subr.bf16.mxu0 %v3665_v45  ;;  %2328 = vmatprep.subr.bf16.mxu1 %v3667_v48  ;;  %v389_v45 = vunpack.c.l.bf16 %v360_v36  ;;  %v409_v48 = vadd.f32 %v373_v40, %v365_v37  ;;  %v472_v51 = vadd.f32 %v390_v46, %v382_v43  ;;  %v3740_v36 = vld [vmem:[%s4158_s22 + $0x368] ss:$16 sps:$4 sm:$0xff]   ;;  %v3743_v43 = vld [vmem:[%s4158_s22 + $0x380] ss:$16 sps:$4 sm:$0xff]  }
  0x68   : > { %v416_v47 = vadd.f32 %v374_v41, %v366_v38  ;;  %v3745_v38 = vld [vmem:[%s4158_s22 + $0x384] ss:$16 sps:$4 sm:$0xff]  }
  0x69   : > { %v465_v52 = vadd.f32 %v389_v45, %v381_v42  ;;  %v410_v55 = vrot.slane %v409_v48, 4  ;;  %v473_v57 = vrot.slane %v472_v51, 4  ;;  %v3748_v42 = vld [vmem:[%s4158_s22 + $0x38c] ss:$16 sps:$4 sm:$0xff]   ;;  %v3751_v45 = vld [vmem:[%s4158_s22 + $0x3a4] ss:$16 sps:$4 sm:$0xff]  }
  0x6a   : > { %2165 = vmatpush1.bf16.msra.mxu0 %v3669_v53  ;;  %2329 = vmatpush1.bf16.msra.mxu1 %v3670_v54  ;;  %v3715_v53 = vld [vmem:[%s4158_s22 + $0x2e4] ss:$16 sps:$4 sm:$0xff]   ;;  %v417_v54 = vrot.slane %v416_v47, 4 }
  0x6b   : > { %2175 = vmatprep.subr.bf16.mxu0 %v3673_v58  ;;  %2339 = vmatprep.subr.bf16.mxu1 %v3676_v61  ;;  %v466_v58 = vrot.slane %v465_v52, 4  ;;  %v3716_v61 = vld [vmem:[%s4158_s22 + $0x2e8] ss:$16 sps:$4 sm:$0xff]   ;;  %v474_v62 = vadd.f32 %v473_v57, %v472_v51  ;;  %v411_v1 = vadd.f32 %v410_v55, %v409_v48  ;;  %v3754_v48 = vld [vmem:[%s4158_s22 + $0x3ac] ss:$16 sps:$4 sm:$0xff]  }
  0x6c   : > { %v418_v59 = vadd.f32 %v417_v54, %v416_v47  ;;  %v3757_v51 = vld [vmem:[%s4158_s22 + $0x3c4] ss:$16 sps:$4 sm:$0xff]   ;;  %v3760_v54 = vld [vmem:[%s4158_s22 + $0x3cc] ss:$16 sps:$4 sm:$0xff]   ;;  %v3755_v55 = vld [vmem:[%s4158_s22 + $0x3c0] ss:$16 sps:$4 sm:$0xff]  }
  0x6d   : > { %2167 = vmatmul.mubr.bf16.vlgmr.msra.gmra.mrb[0].mxu0 %v838_v12  ;;  %2331 = vmatmul.mubr.bf16.vlgmr.msra.gmra.mrb[0].mxu1 %v838_v12  ;;  %v467_v2 = vadd.f32 %v466_v58, %v465_v52  ;;  %v475_v4 = vrot.slane %v474_v62, 2  ;;  %v412_v11 = vrot.slane %v411_v1, 2  ;;  %v3763_v57 = vld [vmem:[%s4158_s22 + $0x3e4] ss:$16 sps:$4 sm:$0xff]  }
  0x6e   : > { %2176 = vmatpush1.bf16.msra.mxu0 %v3671_v8  ;;  %2340 = vmatpush1.bf16.msra.mxu1 %v3674_v9  ;;  %v419_v0 = vrot.slane %v418_v59, 2  ;;  %v3727_v8 = vld [vmem:[%s4158_s22 + $0x324] ss:$16 sps:$4 sm:$0xff]  }
  0x6f   : > { %2177 = vmatprep.subr.bf16.mxu0 %v3679_v13  ;;  %2341 = vmatprep.subr.bf16.mxu1 %v3682_v14  ;;  %v476_v9 = vadd.f32 %v475_v4, %v474_v62  ;;  %v468_v12 = vrot.slane %v467_v2, 2  ;;  %v3730_v13 = vld [vmem:[%s4158_s22 + $0x32c] ss:$16 sps:$4 sm:$0xff]   ;;  %v3764_v62 = vld [vmem:[%s4158_s22 + $0x3e8] ss:$16 sps:$4 sm:$0xff]  }
  0x70   : > { %v420_v6 = vadd.f32 %v419_v0, %v418_v59  ;;  %v4308_v4 = vld [vmem:[%s4160_s23 + $0x10] sm:$0xff] }
  0x71   : > { %v477_v14 = vrot.slane %v476_v9, 1 }
  0x72   : > { %2178 = vmatpush1.bf16.msra.mxu0 %v3677_v15  ;;  %2342 = vmatpush1.bf16.msra.mxu1 %v3680_v16  ;;  %v421_v10 = vrot.slane %v420_v6, 1  ;;  %v3725_v16 = vld [vmem:[%s4158_s22 + $0x320] ss:$16 sps:$4 sm:$0xff]  }
  0x73   : > { %2179 = vmatprep.subr.bf16.mxu0 %v3685_v17  ;;  %2343 = vmatprep.subr.bf16.mxu1 %v3688_v18  ;;  %v3728_v17 = vld [vmem:[%s4158_s22 + $0x328] ss:$16 sps:$4 sm:$0xff]   ;;  %v478_v18 = vadd.f32 %v477_v14, %v476_v9  ;;  %v368_v9 = vunpack.c.h.bf16 %v4308_v4 }
  0x74   : > { %v422_v15 = vadd.f32 %v421_v10, %v420_v6  ;;  %v4311_v6 = vld [vmem:[%s4160_s23 + $0x30] sm:$0xff]  ;;  %v3775_v10 = vld [vmem:[%s4158_s22 + $0x424] ss:$16 sps:$4 sm:$0xff]  }
  0x76   : > { %2180 = vmatpush1.bf16.msra.mxu0 %v3683_v19  ;;  %2344 = vmatpush1.bf16.msra.mxu1 %v3686_v20  ;;  %v3733_v19 = vld [vmem:[%s4158_s22 + $0x344] ss:$16 sps:$4 sm:$0xff]   ;;  %v511_v20 = vmul.f32 0.0625, %v422_v15 }
  0x77   : > { %2181 = vmatprep.subr.bf16.mxu0 %v3691_v21  ;;  %2345 = vmatprep.subr.bf16.mxu1 %v3694_v22  ;;  %v413_v21 = vadd.f32 %v412_v11, %v411_v1  ;;  %v469_v22 = vadd.f32 %v468_v12, %v467_v2  ;;  %v3772_v1 = vld [vmem:[%s4158_s22 + $0x40c] ss:$16 sps:$4 sm:$0xff]   ;;  %v3767_v2 = vld [vmem:[%s4158_s22 + $0x400] ss:$16 sps:$4 sm:$0xff]   ;;  %v376_v11 = vunpack.c.h.bf16 %v4311_v6 }
  0x79   : > { %v430_v15 = vadd.f32 %v376_v11, %v368_v9  ;;  %v3815_v11 = vld [vmem:[%s4158_s22 + $0x500] ss:$16 sps:$4 sm:$0xff]  }
  0x7a   : > { %2182 = vmatpush1.bf16.msra.mxu0 %v3689_v23  ;;  %2346 = vmatpush1.bf16.msra.mxu1 %v3692_v24  ;;  %v3736_v23 = vld [vmem:[%s4158_s22 + $0x34c] ss:$16 sps:$4 sm:$0xff]   ;;  %v519_v24 = vmul.f32 0.0625, %v478_v18 }
  0x7b   : > { %2183 = vmatprep.subr.bf16.mxu0 %v3697_v25  ;;  %2347 = vmatprep.subr.bf16.mxu1 %v3700_v26  ;;  %v528_v25 = vpack.c.bf16 %v511_v20, %v511_v20  ;;  %v3731_v26 = vld [vmem:[%s4158_s22 + $0x340] ss:$16 sps:$4 sm:$0xff]   ;;  %v431_v20 = vrot.slane %v430_v15, 4 }
  0x7e   : > { %2184 = vmatpush1.bf16.msra.mxu0 %v3695_v27  ;;  %2348 = vmatpush1.bf16.msra.mxu1 %v3698_v28  ;;  %v3734_v27 = vld [vmem:[%s4158_s22 + $0x348] ss:$16 sps:$4 sm:$0xff]   ;;  %v536_v28 = vpack.c.bf16 %v519_v24, %v519_v24  ;;  %v3779_v24 = vld [vmem:[%s4158_s22 + $0x440] ss:$16 sps:$4 sm:$0xff]  }
  0x7f   : > { %2185 = vmatprep.subr.bf16.mxu0 %v3703_v29  ;;  %2349 = vmatprep.subr.bf16.mxu1 %v3706_v30  ;;  %v3739_v29 = vld [vmem:[%s4158_s22 + $0x364] ss:$16 sps:$4 sm:$0xff]   ;;  %v816_v30 = vunpack.c.l.b16 %v528_v25  ;;  %v3782_v25 = vld [vmem:[%s4158_s22 + $0x448] ss:$16 sps:$4 sm:$0xff]  }
  0x80   : > { %v824_v34 = vunpack.c.l.b16 %v536_v28 }
  0x82   : > { %2186 = vmatpush1.bf16.msra.mxu0 %v3701_v31  ;;  %2350 = vmatpush1.bf16.msra.mxu1 %v3704_v32  ;;  %v414_v31 = vrot.slane %v413_v21, 1  ;;  %v470_v32 = vrot.slane %v469_v22, 1  ;;  %v833_v37 = vsel %vm829_vm0, %v824_v34, %v816_v30 }
  0x83   : > { %2187 = vmatprep.subr.bf16.mxu0 %v3709_v39  ;;  %2351 = vmatprep.subr.bf16.mxu1 %v3712_v44  ;;  %v841_v39 = vpack.c.b16 %v833_v37, %v833_v37  ;;  %v3746_v44 = vld [vmem:[%s4158_s22 + $0x388] ss:$16 sps:$4 sm:$0xff]   ;;  %v3796_v37 = vld [vmem:[%s4158_s22 + $0x48c] ss:$16 sps:$4 sm:$0xff]  }
  0x84   : > { %v415_v40 = vadd.f32 %v414_v31, %v413_v21  ;;  %v471_v41 = vadd.f32 %v470_v32, %v469_v22  ;;  %v3784_v21 = vld [vmem:[%s4158_s22 + $0x44c] ss:$16 sps:$4 sm:$0xff]   ;;  %v3785_v32 = vld [vmem:[%s4158_s22 + $0x460] ss:$16 sps:$4 sm:$0xff]  }
  0x85   : > { %2207 = vmatprep.mubr.bf16.mxu0 %v841_v39  ;;  %2371 = vmatprep.mubr.bf16.mxu1 %v841_v39 }
  0x86   : > { %2188 = vmatpush1.bf16.msra.mxu0 %v3707_v49  ;;  %2352 = vmatpush1.bf16.msra.mxu1 %v3710_v50  ;;  %v510_v46 = vmul.f32 0.0625, %v415_v40  ;;  %v518_v47 = vmul.f32 0.0625, %v471_v41  ;;  %v3749_v49 = vld [vmem:[%s4158_s22 + $0x3a0] ss:$16 sps:$4 sm:$0xff]   ;;  %v3752_v50 = vld [vmem:[%s4158_s22 + $0x3a8] ss:$16 sps:$4 sm:$0xff]  }
  0x87   : > { %2189 = vmatprep.subr.bf16.mxu0 %v3715_v53  ;;  %2353 = vmatprep.subr.bf16.mxu1 %v3718_v56  ;;  %v3758_v56 = vld [vmem:[%s4158_s22 + $0x3c8] ss:$16 sps:$4 sm:$0xff]   ;;  %v3791_v40 = vld [vmem:[%s4158_s22 + $0x480] ss:$16 sps:$4 sm:$0xff]  }
  0x88   : > { %v527_v52 = vpack.c.bf16 %v510_v46, %v510_v46  ;;  %v535_v53 = vpack.c.bf16 %v518_v47, %v518_v47  ;;  %v3794_v41 = vld [vmem:[%s4158_s22 + $0x488] ss:$16 sps:$4 sm:$0xff]  }
  0x8a   : > { %2190 = vmatpush1.bf16.msra.mxu0 %v3713_v60  ;;  %2354 = vmatpush1.bf16.msra.mxu1 %v3716_v61  ;;  %v815_v58 = vunpack.c.l.b16 %v527_v52  ;;  %v823_v59 = vunpack.c.l.b16 %v535_v53  ;;  %v3766_v60 = vld [vmem:[%s4158_s22 + $0x3ec] ss:$16 sps:$4 sm:$0xff]   ;;  %v3761_v61 = vld [vmem:[%s4158_s22 + $0x3e0] ss:$16 sps:$4 sm:$0xff]   ;;  %v3800_v53 = vld [vmem:[%s4158_s22 + $0x4a8] ss:$16 sps:$4 sm:$0xff]  }
  0x8b   : > { %2191 = vmatprep.subr.bf16.mxu0 %v3721_v63  ;;  %2355 = vmatprep.subr.bf16.mxu1 %v3724_v3  ;;  %v3769_v63 = vld [vmem:[%s4158_s22 + $0x404] ss:$16 sps:$4 sm:$0xff]   ;;  %v3770_v3 = vld [vmem:[%s4158_s22 + $0x408] ss:$16 sps:$4 sm:$0xff]   ;;  %v3797_v52 = vld [vmem:[%s4158_s22 + $0x4a0] ss:$16 sps:$4 sm:$0xff]  }
  0x8c   : > { %v832_v0 = vsel %vm829_vm0, %v823_v59, %v815_v58  ;;  %v3808_v59 = vld [vmem:[%s4158_s22 + $0x4cc] ss:$16 sps:$4 sm:$0xff]  }
  0x8e   : > { %2192 = vmatpush1.bf16.msra.mxu0 %v3719_v5  ;;  %2356 = vmatpush1.bf16.msra.mxu1 %v3722_v7  ;;  %v840_v5 = vpack.c.b16 %v832_v0, %v832_v0  ;;  %v4314_v7 = vld [vmem:[%s4160_s23 + $0x50] sm:$0xff]  ;;  %v3811_v0 = vld [vmem:[%s4158_s22 + $0x4e4] ss:$16 sps:$4 sm:$0xff]  }
  0x8f   : > { %2193 = vmatprep.subr.bf16.mxu0 %v3727_v8  ;;  %2357 = vmatprep.subr.bf16.mxu1 %v3730_v13  ;;  %v4317_v8 = vld [vmem:[%s4160_s23 + $0x70] sm:$0xff]  ;;  %v384_v12 = vunpack.c.h.bf16 %v4314_v7  ;;  %v383_v46 = vunpack.c.l.bf16 %v4314_v7  ;;  %v3817_v7 = vld [vmem:[%s4158_s22 + $0x504] ss:$16 sps:$4 sm:$0xff]  }
  0x90   : > { %v3778_v13 = vld [vmem:[%s4158_s22 + $0x42c] ss:$16 sps:$4 sm:$0xff]   ;;  %v392_v14 = vunpack.c.h.bf16 %v4317_v8  ;;  %v391_v47 = vunpack.c.l.bf16 %v4317_v8 }
  0x92   : > { %2194 = vmatpush1.bf16.msra.mxu0 %v3725_v16  ;;  %2358 = vmatpush1.bf16.msra.mxu1 %v3728_v17  ;;  %v3773_v16 = vld [vmem:[%s4158_s22 + $0x420] ss:$16 sps:$4 sm:$0xff]   ;;  %v3776_v17 = vld [vmem:[%s4158_s22 + $0x428] ss:$16 sps:$4 sm:$0xff]   ;;  %v486_v18 = vadd.f32 %v392_v14, %v384_v12  ;;  %v479_v58 = vadd.f32 %v391_v47, %v383_v46 }
  0x93   : > { %2195 = vmatprep.subr.bf16.mxu0 %v3733_v19  ;;  %2359 = vmatprep.subr.bf16.mxu1 %v3736_v23  ;;  %v3781_v19 = vld [vmem:[%s4158_s22 + $0x444] ss:$16 sps:$4 sm:$0xff]   ;;  %v432_v23 = vadd.f32 %v431_v20, %v430_v15  ;;  %v3818_v12 = vld [vmem:[%s4158_s22 + $0x508] ss:$16 sps:$4 sm:$0xff]  }
  0x94   : > { %v487_v22 = vrot.slane %v486_v18, 4  ;;  %v3842_v46 = vld [vmem:[%s4158_s22 + $0x588] ss:$16 sps:$4 sm:$0xff]  }
  0x95   : > { %v433_v28 = vrot.slane %v432_v23, 2 }
  0x96   : > { %2196 = vmatpush1.bf16.msra.mxu0 %v3731_v26  ;;  %2360 = vmatpush1.bf16.msra.mxu1 %v3734_v27  ;;  %v488_v26 = vadd.f32 %v487_v22, %v486_v18  ;;  %v3787_v27 = vld [vmem:[%s4158_s22 + $0x464] ss:$16 sps:$4 sm:$0xff]   ;;  %v3824_v18 = vld [vmem:[%s4158_s22 + $0x528] ss:$16 sps:$4 sm:$0xff]   ;;  %v3832_v22 = vld [vmem:[%s4158_s22 + $0x54c] ss:$16 sps:$4 sm:$0xff]  }
  0x97   : > { %2197 = vmatprep.subr.bf16.mxu0 %v3739_v29  ;;  %2361 = vmatprep.subr.bf16.mxu1 %v3742_v33  ;;  %v3790_v29 = vld [vmem:[%s4158_s22 + $0x46c] ss:$16 sps:$4 sm:$0xff]   ;;  %v434_v31 = vadd.f32 %v433_v28, %v432_v23  ;;  %v3788_v33 = vld [vmem:[%s4158_s22 + $0x468] ss:$16 sps:$4 sm:$0xff]   ;;  %v3827_v23 = vld [vmem:[%s4158_s22 + $0x540] ss:$16 sps:$4 sm:$0xff]  }
  0x98   : > { %v489_v30 = vrot.slane %v488_v26, 2  ;;  %v3838_v28 = vld [vmem:[%s4158_s22 + $0x56c] ss:$16 sps:$4 sm:$0xff]  }
  0x9a   : > { %2198 = vmatpush1.bf16.msra.mxu0 %v3737_v35  ;;  %2362 = vmatpush1.bf16.msra.mxu1 %v3740_v36  ;;  %v490_v34 = vadd.f32 %v489_v30, %v488_v26  ;;  %v3793_v35 = vld [vmem:[%s4158_s22 + $0x484] ss:$16 sps:$4 sm:$0xff]   ;;  %v435_v36 = vrot.slane %v434_v31, 1 }
  0x9b   : > { %2199 = vmatprep.subr.bf16.mxu0 %v3745_v38  ;;  %2363 = vmatprep.subr.bf16.mxu1 %v3748_v42  ;;  %v367_v42 = vunpack.c.l.bf16 %v4308_v4  ;;  %v3814_v4 = vld [vmem:[%s4158_s22 + $0x4ec] ss:$16 sps:$4 sm:$0xff]   ;;  %v4374_v30 = vld [vmem:[%s4160_s23 + $0x38] sm:$0xff] }
  0x9c   : > { %v491_v38 = vrot.slane %v490_v34, 1  ;;  %v436_v39 = vadd.f32 %v435_v36, %v434_v31  ;;  %v4377_v31 = vld [vmem:[%s4160_s23 + $0x58] sm:$0xff] }
  0x9e   : > { %2200 = vmatpush1.bf16.msra.mxu0 %v3743_v43  ;;  %2364 = vmatpush1.bf16.msra.mxu1 %v3746_v44  ;;  %v492_v43 = vadd.f32 %v491_v38, %v490_v34  ;;  %v3799_v44 = vld [vmem:[%s4158_s22 + $0x4a4] ss:$16 sps:$4 sm:$0xff]   ;;  %v3833_v34 = vld [vmem:[%s4158_s22 + $0x560] ss:$16 sps:$4 sm:$0xff]   ;;  %v378_v38 = vunpack.c.h.bf16 %v4374_v30 }
  0x9f   : > { %2201 = vmatprep.subr.bf16.mxu0 %v3751_v45  ;;  %2365 = vmatprep.subr.bf16.mxu1 %v3754_v48  ;;  %v375_v45 = vunpack.c.l.bf16 %v4311_v6  ;;  %v513_v48 = vmul.f32 0.0625, %v436_v39  ;;  %v3812_v6 = vld [vmem:[%s4158_s22 + $0x4e8] ss:$16 sps:$4 sm:$0xff]   ;;  %v386_v39 = vunpack.c.h.bf16 %v4377_v31 }
  0xa2   : > { %2202 = vmatpush1.bf16.msra.mxu0 %v3749_v49  ;;  %2366 = vmatpush1.bf16.msra.mxu1 %v3752_v50  ;;  %v3802_v49 = vld [vmem:[%s4158_s22 + $0x4ac] ss:$16 sps:$4 sm:$0xff]   ;;  %v521_v50 = vmul.f32 0.0625, %v492_v43 }
  0xa3   : > { %2203 = vmatprep.subr.bf16.mxu0 %v3757_v51  ;;  %2367 = vmatprep.subr.bf16.mxu1 %v3760_v54  ;;  %v530_v51 = vpack.c.bf16 %v513_v48, %v513_v48 }
  0xa4   : > { %v538_v54 = vpack.c.bf16 %v521_v50, %v521_v50  ;;  %v3847_v50 = vld [vmem:[%s4158_s22 + $0x5a4] ss:$16 sps:$4 sm:$0xff]  }
  0xa6   : > { %2204 = vmatpush1.bf16.msra.mxu0 %v3755_v55  ;;  %2368 = vmatpush1.bf16.msra.mxu1 %v3758_v56  ;;  %v3805_v55 = vld [vmem:[%s4158_s22 + $0x4c4] ss:$16 sps:$4 sm:$0xff]   ;;  %v818_v56 = vunpack.c.l.b16 %v530_v51  ;;  %v3850_v51 = vld [vmem:[%s4158_s22 + $0x5ac] ss:$16 sps:$4 sm:$0xff]  }
  0xa7   : > { %2205 = vmatprep.subr.bf16.mxu0 %v3763_v57  ;;  %2369 = vmatprep.subr.bf16.mxu1 %v3766_v60  ;;  %v423_v57 = vadd.f32 %v375_v45, %v367_v42  ;;  %v826_v60 = vunpack.c.l.b16 %v538_v54 }
  0xaa   : > { %2206 = vmatpush1.bf16.msra.mxu0 %v3761_v61  ;;  %2370 = vmatpush1.bf16.msra.mxu1 %v3764_v62  ;;  %v3803_v61 = vld [vmem:[%s4158_s22 + $0x4c0] ss:$16 sps:$4 sm:$0xff]   ;;  %v3806_v62 = vld [vmem:[%s4158_s22 + $0x4c8] ss:$16 sps:$4 sm:$0xff]  }
  0xab   : > { %2216 = vmatprep.subr.bf16.mxu0 %v3769_v63  ;;  %2380 = vmatprep.subr.bf16.mxu1 %v3772_v1  ;;  %v835_v63 = vsel %vm829_vm0, %v826_v60, %v818_v56  ;;  %v3848_v56 = vld [vmem:[%s4158_s22 + $0x5a8] ss:$16 sps:$4 sm:$0xff]   ;;  %v3853_v60 = vld [vmem:[%s4158_s22 + $0x5c4] ss:$16 sps:$4 sm:$0xff]  }
  0xac   : > { %v843_v1 = vpack.c.b16 %v835_v63, %v835_v63 }
  0xad   : > { %2208 = vmatmul.mubr.bf16.vlgmr.msra.gmra.mrb[0].mxu0 %v840_v5  ;;  %2372 = vmatmul.mubr.bf16.vlgmr.msra.gmra.mrb[0].mxu1 %v840_v5  ;;  %v3809_v5 = vld [vmem:[%s4158_s22 + $0x4e0] ss:$16 sps:$4 sm:$0xff]  }
  0xae   : > { %2217 = vmatpush1.bf16.msra.mxu0 %v3767_v2  ;;  %2381 = vmatpush1.bf16.msra.mxu1 %v3770_v3  ;;  %v424_v2 = vrot.slane %v423_v57, 4  ;;  %v480_v3 = vrot.slane %v479_v58, 4 }
  0xaf   : > { %2218 = vmatprep.subr.bf16.mxu0 %v3775_v10  ;;  %2382 = vmatprep.subr.bf16.mxu1 %v3778_v13  ;;  %v3820_v10 = vld [vmem:[%s4158_s22 + $0x50c] ss:$16 sps:$4 sm:$0xff]   ;;  %v3823_v13 = vld [vmem:[%s4158_s22 + $0x524] ss:$16 sps:$4 sm:$0xff]  }
  0xb0   : > { %2248 = vmatprep.mubr.bf16.mxu0 %v843_v1  ;;  %2412 = vmatprep.mubr.bf16.mxu1 %v843_v1  ;;  %v425_v8 = vadd.f32 %v424_v2, %v423_v57  ;;  %v481_v9 = vadd.f32 %v480_v3, %v479_v58  ;;  %v3851_v1 = vld [vmem:[%s4158_s22 + $0x5c0] ss:$16 sps:$4 sm:$0xff]   ;;  %v3854_v2 = vld [vmem:[%s4158_s22 + $0x5c8] ss:$16 sps:$4 sm:$0xff]  }
  0xb2   : > { %2219 = vmatpush1.bf16.msra.mxu0 %v3773_v16  ;;  %2383 = vmatpush1.bf16.msra.mxu1 %v3776_v17  ;;  %v426_v14 = vrot.slane %v425_v8, 2  ;;  %v482_v15 = vrot.slane %v481_v9, 2  ;;  %v3826_v16 = vld [vmem:[%s4158_s22 + $0x52c] ss:$16 sps:$4 sm:$0xff]   ;;  %v3821_v17 = vld [vmem:[%s4158_s22 + $0x520] ss:$16 sps:$4 sm:$0xff]  }
  0xb3   : > { %2220 = vmatprep.subr.bf16.mxu0 %v3781_v19  ;;  %2384 = vmatprep.subr.bf16.mxu1 %v3784_v21  ;;  %v3829_v19 = vld [vmem:[%s4158_s22 + $0x544] ss:$16 sps:$4 sm:$0xff]  }
  0xb4   : > { %v427_v20 = vadd.f32 %v426_v14, %v425_v8  ;;  %v483_v21 = vadd.f32 %v482_v15, %v481_v9  ;;  %v3865_v15 = vld [vmem:[%s4158_s22 + $0x604] ss:$16 sps:$4 sm:$0xff]  }
  0xb6   : > { %2221 = vmatpush1.bf16.msra.mxu0 %v3779_v24  ;;  %2385 = vmatpush1.bf16.msra.mxu1 %v3782_v25  ;;  %v3830_v24 = vld [vmem:[%s4158_s22 + $0x548] ss:$16 sps:$4 sm:$0xff]   ;;  %v3835_v25 = vld [vmem:[%s4158_s22 + $0x564] ss:$16 sps:$4 sm:$0xff]   ;;  %v428_v26 = vrot.slane %v427_v20, 1 }
  0xb7   : > { %2222 = vmatprep.subr.bf16.mxu0 %v3787_v27  ;;  %2386 = vmatprep.subr.bf16.mxu1 %v3790_v29  ;;  %v484_v27 = vrot.slane %v483_v21, 1  ;;  %v4371_v29 = vld [vmem:[%s4160_s23 + $0x18] sm:$0xff] }
  0xb8   : > { %v429_v36 = vadd.f32 %v428_v26, %v427_v20 }
  0xba   : > { %2223 = vmatpush1.bf16.msra.mxu0 %v3785_v32  ;;  %2387 = vmatpush1.bf16.msra.mxu1 %v3788_v33  ;;  %v4380_v32 = vld [vmem:[%s4160_s23 + $0x78] sm:$0xff]  ;;  %v370_v33 = vunpack.c.h.bf16 %v4371_v29  ;;  %v512_v47 = vmul.f32 0.0625, %v429_v36  ;;  %v3880_v36 = vld [vmem:[%s4158_s22 + $0x64c] ss:$16 sps:$4 sm:$0xff]  }
  0xbb   : > { %2224 = vmatprep.subr.bf16.mxu0 %v3793_v35  ;;  %2388 = vmatprep.subr.bf16.mxu1 %v3796_v37  ;;  %v3836_v35 = vld [vmem:[%s4158_s22 + $0x568] ss:$16 sps:$4 sm:$0xff]   ;;  %v485_v37 = vadd.f32 %v484_v27, %v483_v21  ;;  %v394_v42 = vunpack.c.h.bf16 %v4380_v32  ;;  %v3863_v21 = vld [vmem:[%s4158_s22 + $0x600] ss:$16 sps:$4 sm:$0xff]  }
  0xbc   : > { %v444_v43 = vadd.f32 %v378_v38, %v370_v33  ;;  %v529_v57 = vpack.c.bf16 %v512_v47, %v512_v47  ;;  %v3872_v33 = vld [vmem:[%s4158_s22 + $0x628] ss:$16 sps:$4 sm:$0xff]   ;;  %v369_v47 = vunpack.c.l.bf16 %v4371_v29 }
  0xbd   : > { %v500_v45 = vadd.f32 %v394_v42, %v386_v39  ;;  %v520_v48 = vmul.f32 0.0625, %v485_v37  ;;  %v3875_v37 = vld [vmem:[%s4158_s22 + $0x640] ss:$16 sps:$4 sm:$0xff]   ;;  %v3878_v38 = vld [vmem:[%s4158_s22 + $0x648] ss:$16 sps:$4 sm:$0xff]  }
  0xbe   : > { %2225 = vmatpush1.bf16.msra.mxu0 %v3791_v40  ;;  %2389 = vmatpush1.bf16.msra.mxu1 %v3794_v41  ;;  %v3841_v40 = vld [vmem:[%s4158_s22 + $0x584] ss:$16 sps:$4 sm:$0xff]   ;;  %v3844_v41 = vld [vmem:[%s4158_s22 + $0x58c] ss:$16 sps:$4 sm:$0xff]   ;;  %v817_v3 = vunpack.c.l.b16 %v529_v57  ;;  %v3884_v42 = vld [vmem:[%s4158_s22 + $0x668] ss:$16 sps:$4 sm:$0xff]  }
  0xbf   : > { %2226 = vmatprep.subr.bf16.mxu0 %v3799_v44  ;;  %2390 = vmatprep.subr.bf16.mxu1 %v3802_v49  ;;  %v3839_v44 = vld [vmem:[%s4158_s22 + $0x580] ss:$16 sps:$4 sm:$0xff]   ;;  %v445_v49 = vrot.slane %v444_v43, 4  ;;  %v537_v58 = vpack.c.bf16 %v520_v48, %v520_v48  ;;  %v3883_v39 = vld [vmem:[%s4158_s22 + $0x664] ss:$16 sps:$4 sm:$0xff]   ;;  %v377_v48 = vunpack.c.l.bf16 %v4374_v30 }
  0xc0   : > { %v3901_v30 = vld [vmem:[%s4158_s22 + $0x6c4] ss:$16 sps:$4 sm:$0xff]  }
  0xc1   : > { %v437_v29 = vadd.f32 %v377_v48, %v369_v47  ;;  %v3955_v47 = vld [vmem:[%s4158_s22 + $0x7e4] ss:$16 sps:$4 sm:$0xff]   ;;  %v3958_v48 = vld [vmem:[%s4158_s22 + $0x7ec] ss:$16 sps:$4 sm:$0xff]  }
  0xc2   : > { %2227 = vmatpush1.bf16.msra.mxu0 %v3797_v52  ;;  %2391 = vmatpush1.bf16.msra.mxu1 %v3800_v53  ;;  %v501_v52 = vrot.slane %v500_v45, 4  ;;  %v446_v53 = vadd.f32 %v445_v49, %v444_v43  ;;  %v3889_v43 = vld [vmem:[%s4158_s22 + $0x684] ss:$16 sps:$4 sm:$0xff]   ;;  %v385_v49 = vunpack.c.l.bf16 %v4377_v31  ;;  %v3904_v31 = vld [vmem:[%s4158_s22 + $0x6cc] ss:$16 sps:$4 sm:$0xff]  }
  0xc3   : > { %2228 = vmatprep.subr.bf16.mxu0 %v3805_v55  ;;  %2392 = vmatprep.subr.bf16.mxu1 %v3808_v59  ;;  %v3845_v55 = vld [vmem:[%s4158_s22 + $0x5a0] ss:$16 sps:$4 sm:$0xff]   ;;  %v438_v57 = vrot.slane %v437_v29, 4 }
  0xc4   : > { %v502_v54 = vadd.f32 %v501_v52, %v500_v45  ;;  %v447_v59 = vrot.slane %v446_v53, 2  ;;  %v3887_v45 = vld [vmem:[%s4158_s22 + $0x680] ss:$16 sps:$4 sm:$0xff]   ;;  %v3898_v52 = vld [vmem:[%s4158_s22 + $0x6ac] ss:$16 sps:$4 sm:$0xff]  }
  0xc6   : > { %2229 = vmatpush1.bf16.msra.mxu0 %v3803_v61  ;;  %2393 = vmatpush1.bf16.msra.mxu1 %v3806_v62  ;;  %v3856_v61 = vld [vmem:[%s4158_s22 + $0x5cc] ss:$16 sps:$4 sm:$0xff]   ;;  %v503_v62 = vrot.slane %v502_v54, 2  ;;  %v448_v63 = vadd.f32 %v447_v59, %v446_v53  ;;  %v3893_v53 = vld [vmem:[%s4158_s22 + $0x6a0] ss:$16 sps:$4 sm:$0xff]  }
  0xc7   : > { %2230 = vmatprep.subr.bf16.mxu0 %v3811_v0  ;;  %2394 = vmatprep.subr.bf16.mxu1 %v3814_v4  ;;  %v825_v4 = vunpack.c.l.b16 %v537_v58  ;;  %v3907_v59 = vld [vmem:[%s4158_s22 + $0x6e4] ss:$16 sps:$4 sm:$0xff]  }
  0xc8   : > { %v504_v0 = vadd.f32 %v503_v62, %v502_v54  ;;  %v3896_v54 = vld [vmem:[%s4158_s22 + $0x6a8] ss:$16 sps:$4 sm:$0xff]  }
  0xc9   : > { %v3908_v62 = vld [vmem:[%s4158_s22 + $0x6e8] ss:$16 sps:$4 sm:$0xff]  }
  0xca   : > { %2231 = vmatpush1.bf16.msra.mxu0 %v3809_v5  ;;  %2395 = vmatpush1.bf16.msra.mxu1 %v3812_v6  ;;  %v449_v5 = vrot.slane %v448_v63, 1  ;;  %v3859_v6 = vld [vmem:[%s4158_s22 + $0x5e4] ss:$16 sps:$4 sm:$0xff]   ;;  %v505_v8 = vrot.slane %v504_v0, 1 }
  0xcb   : > { %2232 = vmatprep.subr.bf16.mxu0 %v3817_v7  ;;  %2396 = vmatprep.subr.bf16.mxu1 %v3820_v10  ;;  %v3862_v7 = vld [vmem:[%s4158_s22 + $0x5ec] ss:$16 sps:$4 sm:$0xff]  }
  0xcc   : > { %v450_v9 = vadd.f32 %v449_v5, %v448_v63  ;;  %v506_v10 = vadd.f32 %v505_v8, %v504_v0  ;;  %v439_v63 = vadd.f32 %v438_v57, %v437_v29  ;;  %v3922_v8 = vld [vmem:[%s4158_s22 + $0x72c] ss:$16 sps:$4 sm:$0xff]   ;;  %v2471_v29 = vlaneseq }
  0xce   : > { %2233 = vmatpush1.bf16.msra.mxu0 %v3815_v11  ;;  %2397 = vmatpush1.bf16.msra.mxu1 %v3818_v12  ;;  %v3857_v11 = vld [vmem:[%s4158_s22 + $0x5e0] ss:$16 sps:$4 sm:$0xff]   ;;  %v3860_v12 = vld [vmem:[%s4158_s22 + $0x5e8] ss:$16 sps:$4 sm:$0xff]   ;;  %v515_v14 = vmul.f32 0.0625, %v450_v9  ;;  %v440_v5 = vrot.slane %v439_v63, 2 }
  0xcf   : > { %2234 = vmatprep.subr.bf16.mxu0 %v3823_v13  ;;  %2398 = vmatprep.subr.bf16.mxu1 %v3826_v16  ;;  %v834_v13 = vsel %vm829_vm0, %v825_v4, %v817_v3  ;;  %v3868_v16 = vld [vmem:[%s4158_s22 + $0x60c] ss:$16 sps:$4 sm:$0xff]   ;;  %v3911_v3 = vld [vmem:[%s4158_s22 + $0x700] ss:$16 sps:$4 sm:$0xff]   ;;  %v3914_v4 = vld [vmem:[%s4158_s22 + $0x708] ss:$16 sps:$4 sm:$0xff]  }
  0xd0   : > { %v3917_v9 = vld [vmem:[%s4158_s22 + $0x720] ss:$16 sps:$4 sm:$0xff]  }
  0xd2   : > { %2235 = vmatpush1.bf16.msra.mxu0 %v3821_v17  ;;  %2399 = vmatpush1.bf16.msra.mxu1 %v3824_v18  ;;  %v523_v17 = vmul.f32 0.0625, %v506_v10  ;;  %v532_v18 = vpack.c.bf16 %v515_v14, %v515_v14  ;;  %v3920_v10 = vld [vmem:[%s4158_s22 + $0x728] ss:$16 sps:$4 sm:$0xff]   ;;  %v3928_v14 = vld [vmem:[%s4158_s22 + $0x74c] ss:$16 sps:$4 sm:$0xff]  }
  0xd3   : > { %2236 = vmatprep.subr.bf16.mxu0 %v3829_v19  ;;  %2400 = vmatprep.subr.bf16.mxu1 %v3832_v22  ;;  %v842_v19 = vpack.c.b16 %v834_v13, %v834_v13  ;;  %v3866_v22 = vld [vmem:[%s4158_s22 + $0x608] ss:$16 sps:$4 sm:$0xff]   ;;  %v3925_v13 = vld [vmem:[%s4158_s22 + $0x744] ss:$16 sps:$4 sm:$0xff]  }
  0xd4   : > { %v540_v20 = vpack.c.bf16 %v523_v17, %v523_v17 }
  0xd6   : > { %2237 = vmatpush1.bf16.msra.mxu0 %v3827_v23  ;;  %2401 = vmatpush1.bf16.msra.mxu1 %v3830_v24  ;;  %v820_v23 = vunpack.c.l.b16 %v532_v18  ;;  %v3871_v24 = vld [vmem:[%s4158_s22 + $0x624] ss:$16 sps:$4 sm:$0xff]   ;;  %v828_v26 = vunpack.c.l.b16 %v540_v20  ;;  %v3934_v20 = vld [vmem:[%s4158_s22 + $0x76c] ss:$16 sps:$4 sm:$0xff]  }
  0xd7   : > { %2238 = vmatprep.subr.bf16.mxu0 %v3835_v25  ;;  %2402 = vmatprep.subr.bf16.mxu1 %v3838_v28  ;;  %v3874_v25 = vld [vmem:[%s4158_s22 + $0x62c] ss:$16 sps:$4 sm:$0xff]   ;;  %v3869_v28 = vld [vmem:[%s4158_s22 + $0x620] ss:$16 sps:$4 sm:$0xff]  }
  0xd8   : > { %v837_v27 = vsel %vm829_vm0, %v828_v26, %v820_v23  ;;  %v3940_v26 = vld [vmem:[%s4158_s22 + $0x78c] ss:$16 sps:$4 sm:$0xff]  }
  0xda   : > { %2239 = vmatpush1.bf16.msra.mxu0 %v3833_v34  ;;  %2403 = vmatpush1.bf16.msra.mxu1 %v3836_v35  ;;  %v845_v34 = vpack.c.b16 %v837_v27, %v837_v27  ;;  %v3877_v35 = vld [vmem:[%s4158_s22 + $0x644] ss:$16 sps:$4 sm:$0xff]   ;;  %v3935_v27 = vld [vmem:[%s4158_s22 + $0x780] ss:$16 sps:$4 sm:$0xff]  }
  0xdb   : > { %2240 = vmatprep.subr.bf16.mxu0 %v3841_v40  ;;  %2404 = vmatprep.subr.bf16.mxu1 %v3844_v41  ;;  %v3886_v40 = vld [vmem:[%s4158_s22 + $0x66c] ss:$16 sps:$4 sm:$0xff]   ;;  %v3881_v41 = vld [vmem:[%s4158_s22 + $0x660] ss:$16 sps:$4 sm:$0xff]  }
  0xde   : > { %2241 = vmatpush1.bf16.msra.mxu0 %v3839_v44  ;;  %2405 = vmatpush1.bf16.msra.mxu1 %v3842_v46  ;;  %v3892_v44 = vld [vmem:[%s4158_s22 + $0x68c] ss:$16 sps:$4 sm:$0xff]   ;;  %v3890_v46 = vld [vmem:[%s4158_s22 + $0x688] ss:$16 sps:$4 sm:$0xff]  }
  0xdf   : > { %2242 = vmatprep.subr.bf16.mxu0 %v3847_v50  ;;  %2406 = vmatprep.subr.bf16.mxu1 %v3850_v51  ;;  %v393_v50 = vunpack.c.l.bf16 %v4380_v32  ;;  %v3895_v51 = vld [vmem:[%s4158_s22 + $0x6a4] ss:$16 sps:$4 sm:$0xff]   ;;  %v3899_v32 = vld [vmem:[%s4158_s22 + $0x6c0] ss:$16 sps:$4 sm:$0xff]  }
  0xe2   : > { %2243 = vmatpush1.bf16.msra.mxu0 %v3845_v55  ;;  %2407 = vmatpush1.bf16.msra.mxu1 %v3848_v56  ;;  %v493_v55 = vadd.f32 %v393_v50, %v385_v49  ;;  %v3902_v56 = vld [vmem:[%s4158_s22 + $0x6c8] ss:$16 sps:$4 sm:$0xff]   ;;  %v3953_v49 = vld [vmem:[%s4158_s22 + $0x7e0] ss:$16 sps:$4 sm:$0xff]  }
  0xe3   : > { %2244 = vmatprep.subr.bf16.mxu0 %v3853_v60  ;;  %2408 = vmatprep.subr.bf16.mxu1 %v3856_v61  ;;  %v3910_v60 = vld [vmem:[%s4158_s22 + $0x6ec] ss:$16 sps:$4 sm:$0xff]   ;;  %v3905_v61 = vld [vmem:[%s4158_s22 + $0x6e0] ss:$16 sps:$4 sm:$0xff]   ;;  %v3956_v50 = vld [vmem:[%s4158_s22 + $0x7e8] ss:$16 sps:$4 sm:$0xff]  }
  0xe4   : > { %v494_v58 = vrot.slane %v493_v55, 4 }
  0xe6   : > { %2245 = vmatpush1.bf16.msra.mxu0 %v3851_v1  ;;  %2409 = vmatpush1.bf16.msra.mxu1 %v3854_v2  ;;  %v495_v0 = vadd.f32 %v494_v58, %v493_v55  ;;  %v3913_v1 = vld [vmem:[%s4158_s22 + $0x704] ss:$16 sps:$4 sm:$0xff]   ;;  %v3916_v2 = vld [vmem:[%s4158_s22 + $0x70c] ss:$16 sps:$4 sm:$0xff]  }
  0xe7   : > { %2246 = vmatprep.subr.bf16.mxu0 %v3859_v6  ;;  %2410 = vmatprep.subr.bf16.mxu1 %v3862_v7  ;;  %v3919_v7 = vld [vmem:[%s4158_s22 + $0x724] ss:$16 sps:$4 sm:$0xff]  }
  0xe8   : > { %v496_v6 = vrot.slane %v495_v0, 2 }
  0xea   : > { %2247 = vmatpush1.bf16.msra.mxu0 %v3857_v11  ;;  %2411 = vmatpush1.bf16.msra.mxu1 %v3860_v12  ;;  %v441_v11 = vadd.f32 %v440_v5, %v439_v63  ;;  %v497_v12 = vadd.f32 %v496_v6, %v495_v0  ;;  %v3959_v6 = vld [vmem:[%s4660_s5 + $0x40] sm:$0xff] (!%p3434_p10)  }
  0xeb   : > { %2257 = vmatprep.subr.bf16.mxu0 %v3865_v15  ;;  %2421 = vmatprep.subr.bf16.mxu1 %v3868_v16  ;;  %v3923_v15 = vld [vmem:[%s4158_s22 + $0x740] ss:$16 sps:$4 sm:$0xff]   ;;  %v3926_v16 = vld [vmem:[%s4158_s22 + $0x748] ss:$16 sps:$4 sm:$0xff]  }
  0xec   : > { %v442_v17 = vrot.slane %v441_v11, 1  ;;  %v498_v18 = vrot.slane %v497_v12, 1 }
  0xed   : > { %2249 = vmatmul.mubr.bf16.vlgmr.msra.gmra.mrb[0].mxu0 %v842_v19  ;;  %2413 = vmatmul.mubr.bf16.vlgmr.msra.gmra.mrb[0].mxu1 %v842_v19  ;;  %v3931_v19 = vld [vmem:[%s4158_s22 + $0x764] ss:$16 sps:$4 sm:$0xff]  }
  0xee   : > { %2258 = vmatpush1.bf16.msra.mxu0 %v3863_v21  ;;  %2422 = vmatpush1.bf16.msra.mxu1 %v3866_v22  ;;  %v3929_v21 = vld [vmem:[%s4158_s22 + $0x760] ss:$16 sps:$4 sm:$0xff]   ;;  %v3932_v22 = vld [vmem:[%s4158_s22 + $0x768] ss:$16 sps:$4 sm:$0xff]   ;;  %v443_v23 = vadd.f32 %v442_v17, %v441_v11 }
  0xef   : > { %2259 = vmatprep.subr.bf16.mxu0 %v3871_v24  ;;  %2423 = vmatprep.subr.bf16.mxu1 %v3874_v25  ;;  %v499_v24 = vadd.f32 %v498_v18, %v497_v12  ;;  %v3937_v25 = vld [vmem:[%s4158_s22 + $0x784] ss:$16 sps:$4 sm:$0xff]   ;;  %v3964_v11 = vld [vmem:[%s4660_s5 + $0x8] sm:$0xff] (!%p3434_p10)   ;;  %v3971_v18 = vld [vmem:[%s4660_s5 + $0x58] sm:$0xff] (!%p3434_p10)  }
  0xf0   : > { %2289 = vmatprep.mubr.bf16.mxu0 %v845_v34  ;;  %2453 = vmatprep.mubr.bf16.mxu1 %v845_v34  ;;  %v3965_v12 = vld [vmem:[%s4660_s5 + $0xc8] sm:$0xff] (!%p3434_p10)   ;;  %v3970_v17 = vld [vmem:[%s4660_s5 + $0x90] sm:$0xff] (!%p3434_p10)  }
  0xf1   : > { %v522_v34 = vmul.f32 0.0625, %v499_v24  ;;  %v3977_v24 = vld [vmem:[%s4660_s5 + $0xe0] sm:$0xff] (!%p3434_p10)  }
  0xf2   : > { %2260 = vmatpush1.bf16.msra.mxu0 %v3869_v28  ;;  %2424 = vmatpush1.bf16.msra.mxu1 %v3872_v33  ;;  %v3938_v28 = vld [vmem:[%s4158_s22 + $0x788] ss:$16 sps:$4 sm:$0xff]   ;;  %v514_v33 = vmul.f32 0.0625, %v443_v23  ;;  %v3976_v23 = vld [vmem:[%s4660_s5 + $0x20] sm:$0xff] (!%p3434_p10)  }
  0xf3   : > { %2261 = vmatprep.subr.bf16.mxu0 %v3877_v35  ;;  %2425 = vmatprep.subr.bf16.mxu1 %v3880_v36  ;;  %v3943_v35 = vld [vmem:[%s4158_s22 + $0x7a4] ss:$16 sps:$4 sm:$0xff]   ;;  %v3946_v36 = vld [vmem:[%s4158_s22 + $0x7ac] ss:$16 sps:$4 sm:$0xff]  }
  0xf6   : > { %2262 = vmatpush1.bf16.msra.mxu0 %v3875_v37  ;;  %2426 = vmatpush1.bf16.msra.mxu1 %v3878_v38  ;;  %v3941_v37 = vld [vmem:[%s4158_s22 + $0x7a0] ss:$16 sps:$4 sm:$0xff]   ;;  %v3944_v38 = vld [vmem:[%s4158_s22 + $0x7a8] ss:$16 sps:$4 sm:$0xff]  }
  0xf7   : > { %2263 = vmatprep.subr.bf16.mxu0 %v3883_v39  ;;  %2427 = vmatprep.subr.bf16.mxu1 %v3886_v40  ;;  %v531_v39 = vpack.c.bf16 %v514_v33, %v514_v33  ;;  %v539_v40 = vpack.c.bf16 %v522_v34, %v522_v34  ;;  %v3982_v33 = vld [vmem:[%s4660_s5 + $0xa8] sm:$0xff] (!%p3434_p10)   ;;  %v3983_v34 = vld [vmem:[%s4660_s5 + $0x70] sm:$0xff] (!%p3434_p10)  }
  0xfa   : > { %2264 = vmatpush1.bf16.msra.mxu0 %v3881_v41  ;;  %2428 = vmatpush1.bf16.msra.mxu1 %v3884_v42  ;;  %v3949_v41 = vld [vmem:[%s4158_s22 + $0x7c4] ss:$16 sps:$4 sm:$0xff]   ;;  %v3952_v42 = vld [vmem:[%s4158_s22 + $0x7cc] ss:$16 sps:$4 sm:$0xff]  }
  0xfb   : > { %2265 = vmatprep.subr.bf16.mxu0 %v3889_v43  ;;  %2429 = vmatprep.subr.bf16.mxu1 %v3892_v44  ;;  %v3947_v43 = vld [vmem:[%s4158_s22 + $0x7c0] ss:$16 sps:$4 sm:$0xff]   ;;  %v3950_v44 = vld [vmem:[%s4158_s22 + $0x7c8] ss:$16 sps:$4 sm:$0xff]  }
  0xfe   : > { %2266 = vmatpush1.bf16.msra.mxu0 %v3887_v45  ;;  %2430 = vmatpush1.bf16.msra.mxu1 %v3890_v46  ;;  %v819_v45 = vunpack.c.l.b16 %v531_v39  ;;  %v827_v46 = vunpack.c.l.b16 %v539_v40  ;;  %v3988_v39 = vld [vmem:[%s4660_s5 + $0x38] sm:$0xff] (!%p3434_p10)  }
  0xff   : > { %2267 = vmatprep.subr.bf16.mxu0 %v3895_v51  ;;  %2431 = vmatprep.subr.bf16.mxu1 %v3898_v52  ;;  %v3989_v40 = vld [vmem:[%s4660_s5 + $0xf8] sm:$0xff] (!%p3434_p10)  }
 0x100   : > { %v836_v51 = vsel %vm829_vm0, %v827_v46, %v819_v45 }
 0x101   : > { %v844_v52 = vpack.c.b16 %v836_v51, %v836_v51 }
 0x102   : > { %2268 = vmatpush1.bf16.msra.mxu0 %v3893_v53  ;;  %2432 = vmatpush1.bf16.msra.mxu1 %v3896_v54  ;;  %v4055_v53 = vmov 1983009808  }
 0x103   : > { %2269 = vmatprep.subr.bf16.mxu0 %v3901_v30  ;;  %2433 = vmatprep.subr.bf16.mxu1 %v3904_v31  ;;  %v2469_v54 = vunpack.c.l.s4 %v4055_v53  ;;  %v4475_v30 = vshrl.u32 %v2471_v29, 7 }
 0x105   : > { %v2470_v55 = vunpack.c.0.s8 %v2469_v54 }
 0x106   : > { %2270 = vmatpush1.bf16.msra.mxu0 %v3899_v32  ;;  %2434 = vmatpush1.bf16.msra.mxu1 %v3902_v56 }
 0x107   : > { %2271 = vmatprep.subr.bf16.mxu0 %v3907_v59  ;;  %2435 = vmatprep.subr.bf16.mxu1 %v3910_v60  ;;  %v4478_v56 = vsub.s32 %v2470_v55, %v4475_v30 }
 0x10a   : > { %2272 = vmatpush1.bf16.msra.mxu0 %v3905_v61  ;;  %2436 = vmatpush1.bf16.msra.mxu1 %v3908_v62 }
 0x10b   : > { %2273 = vmatprep.subr.bf16.mxu0 %v3913_v1  ;;  %2437 = vmatprep.subr.bf16.mxu1 %v3916_v2 }
 0x10e   : > { %2274 = vmatpush1.bf16.msra.mxu0 %v3911_v3  ;;  %2438 = vmatpush1.bf16.msra.mxu1 %v3914_v4  ;;  %v524_v3 = vld [vmem:[#allocation2] sm:$0xff] }
 0x10f   : > { %2275 = vmatprep.subr.bf16.mxu0 %v3919_v7  ;;  %2439 = vmatprep.subr.bf16.mxu1 %v3922_v8  ;;  %v3960_v7 = vld [vmem:[%s4660_s5] sm:$0xff] (!%p3434_p10)  }
 0x110   : > { %v3961_v8 = vld [vmem:[%s4660_s5 + $0xc0] sm:$0xff] (!%p3434_p10)  }
 0x112   : > { %2276 = vmatpush1.bf16.msra.mxu0 %v3917_v9  ;;  %2440 = vmatpush1.bf16.msra.mxu1 %v3920_v10  ;;  %v3962_v9 = vld [vmem:[%s4660_s5 + $0x80] sm:$0xff] (!%p3434_p10)   ;;  %v3963_v10 = vld [vmem:[%s4660_s5 + $0x48] sm:$0xff] (!%p3434_p10)  }
 0x113   : > { %2277 = vmatprep.subr.bf16.mxu0 %v3925_v13  ;;  %2441 = vmatprep.subr.bf16.mxu1 %v3928_v14  ;;  %v3966_v13 = vld [vmem:[%s4660_s5 + $0x88] sm:$0xff] (!%p3434_p10)   ;;  %v3967_v14 = vld [vmem:[%s4660_s5 + $0x50] sm:$0xff] (!%p3434_p10)  }
 0x116   : > { %2278 = vmatpush1.bf16.msra.mxu0 %v3923_v15  ;;  %2442 = vmatpush1.bf16.msra.mxu1 %v3926_v16  ;;  %v3968_v15 = vld [vmem:[%s4660_s5 + $0x10] sm:$0xff] (!%p3434_p10)  }
 0x117   : > { %2279 = vmatprep.subr.bf16.mxu0 %v3931_v19  ;;  %2443 = vmatprep.subr.bf16.mxu1 %v3934_v20  ;;  %v3969_v16 = vld [vmem:[%s4660_s5 + $0xd0] sm:$0xff] (!%p3434_p10)   ;;  %v3972_v19 = vld [vmem:[%s4660_s5 + $0x18] sm:$0xff] (!%p3434_p10)  }
 0x118   : > { %v3973_v20 = vld [vmem:[%s4660_s5 + $0xd8] sm:$0xff] (!%p3434_p10)  }
 0x11a   : > { %2280 = vmatpush1.bf16.msra.mxu0 %v3929_v21  ;;  %2444 = vmatpush1.bf16.msra.mxu1 %v3932_v22  ;;  %v3974_v21 = vld [vmem:[%s4660_s5 + $0x98] sm:$0xff] (!%p3434_p10)   ;;  %v3975_v22 = vld [vmem:[%s4660_s5 + $0x60] sm:$0xff] (!%p3434_p10)  }
 0x11b   : > { %2281 = vmatprep.subr.bf16.mxu0 %v3937_v25  ;;  %2445 = vmatprep.subr.bf16.mxu1 %v3940_v26  ;;  %v3978_v25 = vld [vmem:[%s4660_s5 + $0xa0] sm:$0xff] (!%p3434_p10)   ;;  %v3979_v26 = vld [vmem:[%s4660_s5 + $0x68] sm:$0xff] (!%p3434_p10)  }
 0x11e   : > { %2282 = vmatpush1.bf16.msra.mxu0 %v3935_v27  ;;  %2446 = vmatpush1.bf16.msra.mxu1 %v3938_v28  ;;  %v3980_v27 = vld [vmem:[%s4660_s5 + $0x28] sm:$0xff] (!%p3434_p10)  }
 0x11f   : > { %2283 = vmatprep.subr.bf16.mxu0 %v3943_v35  ;;  %2447 = vmatprep.subr.bf16.mxu1 %v3946_v36  ;;  %v3981_v28 = vld [vmem:[%s4660_s5 + $0xe8] sm:$0xff] (!%p3434_p10)   ;;  %v3984_v35 = vld [vmem:[%s4660_s5 + $0x30] sm:$0xff] (!%p3434_p10)  }
 0x120   : > { %v3985_v36 = vld [vmem:[%s4660_s5 + $0xf0] sm:$0xff] (!%p3434_p10)  }
 0x122   : > { %2284 = vmatpush1.bf16.msra.mxu0 %v3941_v37  ;;  %2448 = vmatpush1.bf16.msra.mxu1 %v3944_v38  ;;  %v3986_v37 = vld [vmem:[%s4660_s5 + $0xb0] sm:$0xff] (!%p3434_p10)   ;;  %v3987_v38 = vld [vmem:[%s4660_s5 + $0x78] sm:$0xff] (!%p3434_p10)  }
 0x123   : > { %2285 = vmatprep.subr.bf16.mxu0 %v3949_v41  ;;  %2449 = vmatprep.subr.bf16.mxu1 %v3952_v42 }
 0x126   : > { %2286 = vmatpush1.bf16.msra.mxu0 %v3947_v43  ;;  %2450 = vmatpush1.bf16.msra.mxu1 %v3950_v44  ;;  %v3991_v44 = vld [vmem:[%s4660_s5 + $0xb8] sm:$0xff] (!%p3434_p10)  }
 0x127   : > { %2287 = vmatprep.subr.bf16.mxu0 %v3955_v47  ;;  %2451 = vmatprep.subr.bf16.mxu1 %v3958_v48 }
 0x12a   : > { %2288 = vmatpush1.bf16.msra.mxu0 %v3953_v49  ;;  %2452 = vmatpush1.bf16.msra.mxu1 %v3956_v50 }
 0x12b   : > { %3474 = vmatprep.subr.bf16.mxu0 (!%p3434_p10), %v3959_v6  ;;  %3496 = vmatprep.subr.bf16.mxu1 (!%p3434_p10), %v3961_v8 }
 0x12d   : > { %2290 = vmatmul.mubr.bf16.vlgmr.msra.gmra.mrb[0].mxu0 %v844_v52  ;;  %2454 = vmatmul.mubr.bf16.vlgmr.msra.gmra.mrb[0].mxu1 %v844_v52 }
 0x12e   : > { %3475 = vmatpush3.bf16.msra.mxu0 (!%p3434_p10), %v3960_v7  ;;  %3497 = vmatpush3.bf16.msra.mxu1 (!%p3434_p10), %v3962_v9 }
 0x12f   : > { %3476 = vmatprep.subr.bf16.mxu0 (!%p3434_p10), %v3963_v10  ;;  %3498 = vmatprep.subr.bf16.mxu1 (!%p3434_p10), %v3965_v12 }
 0x132   : > { %3477 = vmatpush3.bf16.msra.mxu0 (!%p3434_p10), %v3964_v11  ;;  %3499 = vmatpush3.bf16.msra.mxu1 (!%p3434_p10), %v3966_v13 }
 0x133   : > { %3478 = vmatprep.subr.bf16.mxu0 (!%p3434_p10), %v3967_v14  ;;  %3500 = vmatprep.subr.bf16.mxu1 (!%p3434_p10), %v3969_v16 }
 0x136   : > { %3479 = vmatpush3.bf16.msra.mxu0 (!%p3434_p10), %v3968_v15  ;;  %3501 = vmatpush3.bf16.msra.mxu1 (!%p3434_p10), %v3970_v17 }
 0x137   : > { %3480 = vmatprep.subr.bf16.mxu0 (!%p3434_p10), %v3971_v18  ;;  %3502 = vmatprep.subr.bf16.mxu1 (!%p3434_p10), %v3973_v20 }
 0x13a   : > { %3481 = vmatpush3.bf16.msra.mxu0 (!%p3434_p10), %v3972_v19  ;;  %3503 = vmatpush3.bf16.msra.mxu1 (!%p3434_p10), %v3974_v21 }
 0x13b   : > { %3482 = vmatprep.subr.bf16.mxu0 (!%p3434_p10), %v3975_v22  ;;  %3504 = vmatprep.subr.bf16.mxu1 (!%p3434_p10), %v3977_v24 }
 0x13e   : > { %3483 = vmatpush3.bf16.msra.mxu0 (!%p3434_p10), %v3976_v23  ;;  %3505 = vmatpush3.bf16.msra.mxu1 (!%p3434_p10), %v3978_v25 }
 0x13f   : > { %3484 = vmatprep.subr.bf16.mxu0 (!%p3434_p10), %v3979_v26  ;;  %3506 = vmatprep.subr.bf16.mxu1 (!%p3434_p10), %v3981_v28 }
 0x142   : > { %3485 = vmatpush3.bf16.msra.mxu0 (!%p3434_p10), %v3980_v27  ;;  %3507 = vmatpush3.bf16.msra.mxu1 (!%p3434_p10), %v3982_v33 }
 0x143   : > { %3486 = vmatprep.subr.bf16.mxu0 (!%p3434_p10), %v3983_v34  ;;  %3508 = vmatprep.subr.bf16.mxu1 (!%p3434_p10), %v3985_v36 }
 0x146   : > { %3487 = vmatpush3.bf16.msra.mxu0 (!%p3434_p10), %v3984_v35  ;;  %3509 = vmatpush3.bf16.msra.mxu1 (!%p3434_p10), %v3986_v37 }
 0x147   : > { %3488 = vmatprep.subr.bf16.mxu0 (!%p3434_p10), %v3987_v38  ;;  %3510 = vmatprep.subr.bf16.mxu1 (!%p3434_p10), %v3989_v40 }
 0x14a   : > { %3489 = vmatpush3.bf16.msra.mxu0 (!%p3434_p10), %v3988_v39  ;;  %3511 = vmatpush3.bf16.msra.mxu1 (!%p3434_p10), %v3991_v44 }
 0x200   : > { %v2291_v31 = vpop.f32.mrb[0].mxu0  ;;  %v2455_v32 = vpop.f32.mrb[0].mxu1 }
 0x201   : > { %v2293_v57 = vpop.f32.mrb[1].mxu0  ;;  %v2457_v58 = vpop.f32.mrb[1].mxu1 }
 0x202   : > { %v2466_v59 = vcombine.low %v2291_v31, %v2293_v57  ;;  %v2467_v60 = vcombine.low %v2455_v32, %v2457_v58  ;;  %v2295_v61 = vpop.f32.mrb[2].mxu0  ;;  %v2459_v62 = vpop.f32.mrb[2].mxu1 }
 0x203   : > { %v2296_v63 = vpop.f32.mrb[3].mxu0  ;;  %v2460_v0 = vpop.f32.mrb[3].mxu1 }
 0x204   : > { %v2474_v1 = vrot.slane %v2466_v59, %v4478_v56  ;;  %v2481_v2 = vrot.slane %v2467_v60, %v4478_v56  ;;  %2489 = sbr.rel (%p3434_p10) target bundleno = 836 (0x344), region = 79 }
 0x206   : > { %v2482_v4 = vcombine.low %v2474_v1, %v2481_v2 }
 0x208   : > { %v2484_v5 = vadd.f32 %v2482_v4, %v524_v3 }
 0x20a   : > { %2485 = vst [vmem:[#allocation2] sm:$0xff] %v2484_v5 }
 0x211   : > { %v2490_v41 = vld [vmem:[#allocation2] sm:$0xff] }
 0x212   : > { %v2492_v42 = vcombine.high %v2490_v41, %v2490_v41  ;;  %v2499_v43 = vrot.slane %v2490_v41, %v4478_v56 }
 0x214   : > { %v2506_v45 = vrot.slane %v2492_v42, %v4478_v56  ;;  %v2507_v46 = vcombine.high %v2499_v43, %v2499_v43  ;;  %v2514_v47 = vsel %vm2513_vm1, %v2499_v43, 0.0 }
 0x215   : > { %v2515_v48 = vrot.slane %v2514_v47, 4 }
 0x216   : > { %v2508_v49 = vcombine.high %v2506_v45, %v2506_v45  ;;  %v2521_v50 = vsel %vm2513_vm1, %v2507_v46, 0.0  ;;  %v2528_v51 = vsel %vm2513_vm1, %v2506_v45, 0.0 }
 0x217   : > { %v2516_v52 = vadd.f32 %v2515_v48, %v2514_v47  ;;  %v2522_v53 = vrot.slane %v2521_v50, 4  ;;  %v2529_v54 = vrot.slane %v2528_v51, 4 }
 0x218   : > { %v2535_v29 = vsel %vm2513_vm1, %v2508_v49, 0.0 }
 0x219   : > { %v2517_v55 = vrot.slane %v2516_v52, 2  ;;  %v2523_v31 = vadd.f32 %v2522_v53, %v2521_v50  ;;  %v2530_v32 = vadd.f32 %v2529_v54, %v2528_v51  ;;  %v2536_v57 = vrot.slane %v2535_v29, 4 }
 0x21b   : > { %v2518_v58 = vadd.f32 %v2517_v55, %v2516_v52  ;;  %v2524_v59 = vrot.slane %v2523_v31, 2  ;;  %v2531_v60 = vrot.slane %v2530_v32, 2  ;;  %v2537_v61 = vadd.f32 %v2536_v57, %v2535_v29 }
 0x21d   : > { %v2519_v62 = vrot.slane %v2518_v58, 1  ;;  %v2525_v63 = vadd.f32 %v2524_v59, %v2523_v31  ;;  %v2532_v0 = vadd.f32 %v2531_v60, %v2530_v32  ;;  %v2538_v1 = vrot.slane %v2537_v61, 2 }
 0x21f   : > { %v2520_v2 = vadd.f32 %v2519_v62, %v2518_v58  ;;  %v2526_v3 = vrot.slane %v2525_v63, 1  ;;  %v2533_v4 = vrot.slane %v2532_v0, 1  ;;  %v2539_v5 = vadd.f32 %v2538_v1, %v2537_v61 }
 0x220   : > { %v2664_v1 = vsub.s32 1, %v4475_v30 }
 0x221   : > { %v2527_v6 = vadd.f32 %v2526_v3, %v2525_v63  ;;  %v2534_v7 = vadd.f32 %v2533_v4, %v2532_v0  ;;  %v2540_v8 = vrot.slane %v2539_v5, 1  ;;  %v2543_v9 = vmul.f32 0.5, %v2520_v2  ;;  %v2656_v4 = vld [vmem:[%s4657_s2] sm:$0xf] }
 0x222   : > { %v2660_v0 = vsub.s32 0, %v4475_v30  ;;  %v2668_v2 = vsub.s32 2, %v4475_v30  ;;  %v2672_v3 = vsub.s32 3, %v4475_v30 }
 0x223   : > { %v2541_v10 = vadd.f32 %v2540_v8, %v2539_v5  ;;  %v2544_v11 = vmul.f32 0.5, %v2527_v6  ;;  %v2545_v12 = vmul.f32 0.5, %v2534_v7  ;;  %v2693_v5 = vld [vmem:[%s4658_s3] sm:$0xf]  ;;  %v2665_v7 = vrot.slane %v2656_v4, %v2664_v1 }
 0x224   : > { %v2661_v6 = vrot.slane %v2656_v4, %v2660_v0  ;;  %v2669_v8 = vrot.slane %v2656_v4, %v2668_v2 }
 0x225   : > { %v2546_v13 = vmul.f32 0.5, %v2541_v10  ;;  %v2551_v14 = vcombine.low %v2543_v9, %v2544_v11  ;;  %v2673_v9 = vrot.slane %v2656_v4, %v2672_v3  ;;  %v2698_v10 = vrot.slane %v2693_v5, %v2660_v0 }
 0x226   : > { %v2702_v11 = vrot.slane %v2693_v5, %v2664_v1 }
 0x227   : > { %v2552_v15 = vcombine.low %v2545_v12, %v2546_v13  ;;  %v2559_v16 = vrot.slane %v2551_v14, %v4478_v56  ;;  %v2706_v12 = vrot.slane %v2693_v5, %v2668_v2  ;;  %v2710_v13 = vrot.slane %v2693_v5, %v2672_v3 }
 0x228   : > { %v2675_v30 = vcombine.low %v2669_v8, %v2673_v9 }
 0x229   : > { %v2566_v17 = vrot.slane %v2552_v15, %v4478_v56  ;;  %v2674_v15 = vcombine.low %v2661_v6, %v2665_v7 }
 0x22b   : > { %v2567_v18 = vcombine.low %v2559_v16, %v2566_v17 }
 0x22d   : > { %v4587_v19 = vsub.f32 %v2490_v41, %v2567_v18 }
 0x22f   : > { %v2570_v20 = vmul.f32 %v4587_v19, %v4587_v19 }
 0x231   : > { %v2572_v21 = vcombine.high %v2570_v20, %v2570_v20  ;;  %v2579_v22 = vrot.slane %v2570_v20, %v4478_v56  ;;  %v2711_v20 = vcombine.low %v2698_v10, %v2702_v11 }
 0x233   : > { %v2586_v23 = vrot.slane %v2572_v21, %v4478_v56  ;;  %v2587_v24 = vcombine.high %v2579_v22, %v2579_v22  ;;  %v2593_v25 = vsel %vm2513_vm1, %v2579_v22, 0.0  ;;  %v2712_v21 = vcombine.low %v2706_v12, %v2710_v13 }
 0x234   : > { %v2594_v26 = vrot.slane %v2593_v25, 4 }
 0x235   : > { %v2588_v27 = vcombine.high %v2586_v23, %v2586_v23  ;;  %v2600_v28 = vsel %vm2513_vm1, %v2587_v24, 0.0  ;;  %v2607_v33 = vsel %vm2513_vm1, %v2586_v23, 0.0 }
 0x236   : > { %v2595_v34 = vadd.f32 %v2594_v26, %v2593_v25  ;;  %v2601_v35 = vrot.slane %v2600_v28, 4  ;;  %v2608_v36 = vrot.slane %v2607_v33, 4  ;;  %v2682_v25 = vrot.slane %v2674_v15, %v4478_v56 }
 0x237   : > { %v2614_v37 = vsel %vm2513_vm1, %v2588_v27, 0.0  ;;  %v2689_v26 = vrot.slane %v2675_v30, %v4478_v56 }
 0x238   : > { %v2596_v38 = vrot.slane %v2595_v34, 2  ;;  %v2602_v39 = vadd.f32 %v2601_v35, %v2600_v28  ;;  %v2609_v40 = vadd.f32 %v2608_v36, %v2607_v33  ;;  %v2615_v41 = vrot.slane %v2614_v37, 4 }
 0x239   : > { %v2719_v28 = vrot.slane %v2711_v20, %v4478_v56  ;;  %v2726_v33 = vrot.slane %v2712_v21, %v4478_v56  ;;  %v2690_v35 = vcombine.low %v2682_v25, %v2689_v26 }
 0x23a   : > { %v2597_v42 = vadd.f32 %v2596_v38, %v2595_v34  ;;  %v2603_v43 = vrot.slane %v2602_v39, 2  ;;  %v2610_v44 = vrot.slane %v2609_v40, 2  ;;  %v2616_v45 = vadd.f32 %v2615_v41, %v2614_v37 }
 0x23b   : > { %v2727_v37 = vcombine.low %v2719_v28, %v2726_v33 }
 0x23c   : > { %v2598_v46 = vrot.slane %v2597_v42, 1  ;;  %v2604_v47 = vadd.f32 %v2603_v43, %v2602_v39  ;;  %v2611_v48 = vadd.f32 %v2610_v44, %v2609_v40  ;;  %v2617_v49 = vrot.slane %v2616_v45, 2  ;;  %v2730_v39 = vld [vmem:[%s4659_s4] sm:$0xff] }
 0x23e   : > { %v2599_v50 = vadd.f32 %v2598_v46, %v2597_v42  ;;  %v2605_v51 = vrot.slane %v2604_v47, 1  ;;  %v2612_v52 = vrot.slane %v2611_v48, 1  ;;  %v2618_v53 = vadd.f32 %v2617_v49, %v2616_v45 }
 0x240   : > { %v2606_v54 = vadd.f32 %v2605_v51, %v2604_v47  ;;  %v2613_v29 = vadd.f32 %v2612_v52, %v2611_v48  ;;  %v2619_v55 = vrot.slane %v2618_v53, 1  ;;  %v2621_v31 = vmul.f32 0.5, %v2599_v50  ;;  %v3435_v51 = vld [vmem:[%s4661_s6] ss:$0 sm:$0xff] }
 0x242   : > { %v2620_v32 = vadd.f32 %v2619_v55, %v2618_v53  ;;  %v2622_v57 = vmul.f32 0.5, %v2606_v54  ;;  %v2623_v58 = vmul.f32 0.5, %v2613_v29  ;;  %v2625_v59 = vadd.f32 1e-05, %v2621_v31 }
 0x244   : > { %v2624_v60 = vmul.f32 0.5, %v2620_v32  ;;  %v2626_v61 = vadd.f32 1e-05, %v2622_v57  ;;  %v2627_v62 = vadd.f32 1e-05, %v2623_v58  ;;  %3992 = vrsqrt.f32 %v2625_v59 }
 0x246   : > { %v2628_v63 = vadd.f32 1e-05, %v2624_v60  ;;  %3994 = vrsqrt.f32 %v2626_v61 }
 0x247   : > { %3996 = vrsqrt.f32 %v2627_v62 }
 0x248   : > { %3998 = vrsqrt.f32 %v2628_v63 }
 0x24e   : > { %v3993_v14 = vpop.eup %3992 }
 0x250   : > { %v3995_v16 = vpop.eup %3994 }
 0x251   : > { %v3997_v17 = vpop.eup %3996  ;;  %v2637_v18 = vcombine.low %v3993_v14, %v3995_v16 }
 0x252   : > { %v3999_v22 = vpop.eup %3998 }
 0x253   : > { %v2638_v23 = vcombine.low %v3997_v17, %v3999_v22  ;;  %v2645_v24 = vrot.slane %v2637_v18, %v4478_v56 }
 0x255   : > { %v2652_v27 = vrot.slane %v2638_v23, %v4478_v56 }
 0x257   : > { %v2653_v34 = vcombine.low %v2645_v24, %v2652_v27 }
 0x259   : > { %v2655_v36 = vmul.f32 %v2653_v34, %v4587_v19 }
 0x25b   : > { %v2692_v38 = vmul.f32 %v2690_v35, %v2655_v36 }
 0x25d   : > { %v2729_v40 = vadd.f32 %v2727_v37, %v2692_v38 }
 0x25f   : > { %v2731_v41 = vmul.f32 %v2730_v39, %v2729_v40 }
 0x261   : > { %v2740_v42 = vrot.slane %v2731_v41, %v4478_v56  ;;  %v2733_v43 = vcombine.high %v2731_v41, %v2731_v41 }
 0x263   : > { %v2748_v44 = vcombine.high %v2740_v42, %v2740_v42  ;;  %v2747_v45 = vrot.slane %v2733_v43, %v4478_v56  ;;  %v2754_v46 = vpack.c.bf16 %v2740_v42, %v2740_v42 }
 0x265   : > { %v2755_v47 = vpack.c.bf16 %v2748_v44, %v2748_v44  ;;  %v2749_v48 = vcombine.high %v2747_v45, %v2747_v45  ;;  %v2756_v49 = vpack.c.bf16 %v2747_v45, %v2747_v45 }
 0x267   : > { %3053 = vmatprep.mubr.bf16.mxu0 %v2755_v47  ;;  %v2757_v19 = vpack.c.bf16 %v2749_v48, %v2749_v48 }
 0x268   : > { %3054 = vmatmul.mubr.bf16.vlgmr.msra.gmra.mrb[0].mxu0 %v2754_v46 }
 0x269   : > { %3093 = vmatprep.mubr.bf16.mxu1 %v2757_v19 }
 0x26a   : > { %3094 = vmatmul.mubr.bf16.vlgmr.msra.gmra.mrb[0].mxu1 %v2756_v49 }
 0x33b   : > { %v3490_v50 = vpop.f32.mrb[0].mxu0 }
 0x33c   : > { %v3491_v52 = vpop.f32.mrb[1].mxu0 }
 0x33d   : > { %v3492_v53 = vadd.f32 %v3491_v52, %v3490_v50  ;;  %v3493_v54 = vpop.f32.mrb[2].mxu0  ;;  %v3512_v29 = vpop.f32.mrb[0].mxu1 }
 0x33e   : > { %v3494_v55 = vpop.f32.mrb[3].mxu0  ;;  %v3513_v56 = vpop.f32.mrb[1].mxu1 }
 0x33f   : > { %v3056_v31 = vadd.f32 %v3492_v53, %v3435_v51  ;;  %v3514_v32 = vadd.f32 %v3513_v56, %v3512_v29  ;;  %v3515_v57 = vpop.f32.mrb[2].mxu1 }
 0x340   : > { %v3516_v58 = vpop.f32.mrb[3].mxu1 }
 0x341   : > { %v3096_v59 = vadd.f32 %v3514_v32, %v3056_v31 }
 0x343   : > { %3101 = vst [vmem:[#allocation4] sm:$0x3] %v3096_v59 }
 0x344 PF: > { %p3546_p11 = scmp.eq.s32.totalorder %s4113_s27, 3  ;;  %s4056_s20 = smov [#allocation4]  }
 0x345   : > { %s3109_s21 = sshll.u32 %s4056_s20, 4  ;;  %s3110_s21 = int_to_ptr.vmem [resolvable:$true] %s3109_s21 }
 0x346   : > { %s4000_s22 = scalar_lea.vmem %s3110_s21, 32  ;;  %p4007_p1 = scmp.lt.s32.totalorder %s3110_s21, %s3110_s21 }
 0x347   : > { %p4001_p12 = scmp.ne.s32.totalorder %s3110_s21, %s4000_s22  ;;  %p4008_p2 = scmp.lt.s32.totalorder %s4000_s22, %s4000_s22 }
 0x349   : > { %p4002_p13 = pnand %p4001_p12, %p3546_p11  ;;  %p4009_p3 = por %p4008_p2, %p4007_p1 }
 0x34b   : > { %p4003_p0 = pneg %p4002_p13 }
 0x34d   : > { %p4010_p4 = pnand %p4009_p3, %p4003_p0 }
 0x34f   : > { %4013 = shalt.err (!%p4010_p4)
}
 0x350   : > { %s4014_s26 = scalar_lea.hbm %s4662_s7, 32 }
 0x351   : > { %p4015_p5 = scmp.ne.s32.totalorder %s4662_s7, %s4014_s26  ;;  %p4020_p8 = scmp.lt.u32.totalorder %s4014_s26, %s4662_s7 }
 0x353   : > { %p4016_p6 = pnand %p4015_p5, %p3546_p11 }
 0x355   : > { %p4017_p7 = pneg %p4016_p6 }
 0x357   : > { %p4022_p9 = pnand %p4020_p8, %p4017_p7 }
 0x359   : > { %4025 = shalt.err (!%p4022_p9)
}
 0x35a   : > { %3543 = dma.vmem_to_hbm [thread:$0]  (%p3546_p11), %s3110_s21, 32, %s4662_s7, [#allocation5]  }
 0x35b   : > { %4039 = dma.done.wait (%p3546_p11), [#allocation5], 32  }
 0x35c   : > { %4041 = vsyncadd (%p3546_p11), [#allocation5], 4294967264 }
 0x35d PF: > { %p15_p10 = scmp.ge.s32.totalorder %s4116_s28, 6   ;;  %s4663_s24 = smov %s4048_s25 }
 0x35e   : > { %s4664_s25 = smov %s4125_s8  ;;  %s4665_s26 = smov %s4116_s28 }
 0x35f   :  { %17 = sbr.rel (!%p15_p10) target bundleno = 2 (0x2), region = 114 }
 0x366   :  { %3122 = vsyncpa [#allocation5], 1 }
 0x367   :  { %3124 = vsyncpa [#allocation5 + $0x1], 1 }

</bundles_post_ra>
